<compile_context>
chip_gen: v7x
topology: tpu7x:2x2x1
jax: 0.10.0
libtpu: 0.0.40
codegen_flags: <defaults>
</compile_context>

<pallas_src>
import functools
import math

import jax
import jax.numpy as jnp
import numpy as np
from jax import lax
from jax.experimental import pallas as pl
from jax.experimental.pallas import tpu as pltpu


# ---------------------------------------------------------------------------
# Pallas kernel
# ---------------------------------------------------------------------------
def _layernorm(v, gamma, beta, eps=1e-5):
    mu = jnp.mean(v, axis=-1, keepdims=True)
    var = jnp.mean(jnp.square(v - mu), axis=-1, keepdims=True)
    return (v - mu) * lax.rsqrt(var + eps) * gamma + beta


def block_kernel(x_ref, ln1g_ref, ln1b_ref, wqkv_ref, wp_ref, bp_ref,
                 ln2g_ref, ln2b_ref, w1_ref, b1_ref, w2_ref, b2_ref,
                 o_ref, *, num_heads, head_size):
    NH, HS = num_heads, head_size
    x = x_ref[...]                                     # (T, C) f32, one sequence / step
    T, C = x.shape

    # ----- ln1 + single fused full-width QKV projection -----
    xn = _layernorm(x, ln1g_ref[...], ln1b_ref[...])
    xnb = xn.astype(jnp.bfloat16)
    qkv = jnp.dot(xnb, wqkv_ref[...], preferred_element_type=jnp.float32)   # (T, 3C)
    qkvb = qkv.astype(jnp.bfloat16)

    # Gather heads once into a batched (NH, T, HS) layout (one relayout per tensor,
    # replaces the old per-(batch,head) slice + 4-lane scratch stores).
    def heads_of(base):
        return jnp.stack(
            [qkvb[:, base + h * HS: base + (h + 1) * HS] for h in range(NH)], axis=0)

    q3 = heads_of(0)          # 1/sqrt(C) score scale already folded into these columns
    k3 = heads_of(C)
    v3 = heads_of(2 * C)

    # ----- batched causal attention over all heads -----
    row = lax.broadcasted_iota(jnp.int32, (T, T), 0)
    col = lax.broadcasted_iota(jnp.int32, (T, T), 1)
    causal = (col <= row)[None, :, :]                  # (1, T, T), broadcasts over heads

    s = jnp.einsum('hqd,hkd->hqk', q3, k3,
                   preferred_element_type=jnp.float32)             # (NH, T, T) f32
    s = jnp.where(causal, s, -jnp.inf)
    s = s - jnp.max(s, axis=-1, keepdims=True)         # diagonal always unmasked -> finite
    p = jnp.exp(s)
    # softmax denominator via EUP approximate reciprocal (frees VALU slots)
    p = p * pl.reciprocal(jnp.sum(p, axis=-1, keepdims=True), approx=True)
    # attention dropout: identity in eval mode
    o3 = jnp.einsum('hqk,hkd->hqd', p.astype(jnp.bfloat16), v3,
                    preferred_element_type=jnp.float32)            # (NH, T, HS) f32

    # Lane-dense assembly in registers: no VMEM scratch, no masked narrow stores.
    attn_heads = jnp.concatenate([o3[h] for h in range(NH)], axis=-1)   # (T, C) f32

    # ----- single full-width output projection + residual 1 -----
    attn = jnp.dot(attn_heads.astype(jnp.bfloat16), wp_ref[...],
                   preferred_element_type=jnp.float32) + bp_ref[...]
    x1 = x + attn                                      # f32 residual

    # ----- ln2 + feedforward + residual 2 -----
    xn2 = _layernorm(x1, ln2g_ref[...], ln2b_ref[...])
    h1 = jnp.dot(xn2.astype(jnp.bfloat16), w1_ref[...],
                 preferred_element_type=jnp.float32) + b1_ref[...]
    h1 = jnp.maximum(h1, 0.0)                          # ReLU
    # TODO(synk): for realistic sizes k-tile this matmul over the 4C hidden dim to
    # bound the (T, 4C) live range on v7x's 64 MiB VMEM.
    ff = jnp.dot(h1.astype(jnp.bfloat16), w2_ref[...],
                 preferred_element_type=jnp.float32) + b2_ref[...]
    o_ref[...] = (x1 + ff).astype(o_ref.dtype)


# ---------------------------------------------------------------------------
# Wrapper
# ---------------------------------------------------------------------------
PARAM_ORDER = ("ln1_g", "ln1_b", "wqkv", "wp", "bp",
               "ln2_g", "ln2_b", "w1", "b1", "w2", "b2")


def _pack_params(params):
    """Pack per-head PyTorch-style params into fused, MXU-friendly operands."""
    NH, C, HS = params["wq"].shape
    scale = 1.0 / math.sqrt(C)            # reference divides scores by sqrt(n_embed)

    def fuse(w):  # (NH, C, HS) -> (C, NH*HS); head h occupies columns [h*HS, (h+1)*HS)
        return jnp.transpose(w, (1, 0, 2)).reshape(C, NH * HS)

    f32, bf16 = jnp.float32, jnp.bfloat16
    # Single packed QKV weight: columns [0,C)=Q (scale folded), [C,2C)=K, [2C,3C)=V.
    wqkv = jnp.concatenate([fuse(params["wq"]) * scale,
                            fuse(params["wk"]),
                            fuse(params["wv"])], axis=1)            # (C, 3C)
    return {
        "ln1_g": params["ln1_g"].astype(f32),
        "ln1_b": params["ln1_b"].astype(f32),
        "wqkv": wqkv.astype(bf16),
        "wp": params["wp"].astype(bf16),
        "bp": params["bp"].astype(f32),
        "ln2_g": params["ln2_g"].astype(f32),
        "ln2_b": params["ln2_b"].astype(f32),
        "w1": params["w1"].astype(bf16),
        "b1": params["b1"].astype(f32),
        "w2": params["w2"].astype(bf16),
        "b2": params["b2"].astype(f32),
    }


@jax.jit
def block_forward(x, params):
    B, T, C = x.shape
    NH, _, HS = params["wq"].shape          # effective #heads / head size (arg swap)
    packed = _pack_params(params)

    # One sequence (T rows) per grid step: a real >=2-wide parallel axis (megacore
    # sharding on v7x, input/output DMA pipelining) with a row tile far inside the
    # scoped VMEM budget. For realistic sizes sweep rows-per-step upward (multiples
    # of 256 for the v6e/v7x 256x256 MXU) to the largest tile that fits.
    x2 = x.reshape(B * T, C)

    def const_spec(arr):
        zeros = (0,) * arr.ndim
        return pl.BlockSpec(arr.shape, lambda i, _z=zeros: _z)

    in_specs = [pl.BlockSpec((T, C), lambda i: (i, 0))]
    in_specs += [const_spec(packed[name]) for name in PARAM_ORDER]

    kernel = functools.partial(block_kernel, num_heads=NH, head_size=HS)

    out = pl.pallas_call(
        kernel,
        out_shape=jax.ShapeDtypeStruct((B * T, C), x.dtype),
        grid=(B,),
        in_specs=in_specs,
        out_specs=pl.BlockSpec((T, C), lambda i: (i, 0)),
        compiler_params=pltpu.CompilerParams(
            dimension_semantics=("parallel",),
            # Explicit so realistic sizes are re-derived deliberately (v5e scoped
            # default is only 16 MiB; v7x physical VMEM is only 64 MiB).
            vmem_limit_bytes=32 * 1024 * 1024),
    )(x2, *[packed[name] for name in PARAM_ORDER])
    return out.reshape(B, T, C)


# ---------------------------------------------------------------------------
# Pure-JAX reference (mirrors the PyTorch module in eval mode, f32)
# ---------------------------------------------------------------------------
def block_reference(x, params):
    def ln(v, g, b):
        mu = jnp.mean(v, axis=-1, keepdims=True)
        var = jnp.mean(jnp.square(v - mu), axis=-1, keepdims=True)
        return (v - mu) / jnp.sqrt(var + 1e-5) * g + b

    B, T, C = x.shape
    NH = params["wq"].shape[0]
    xn = ln(x, params["ln1_g"], params["ln1_b"])
    causal = jnp.tril(jnp.ones((T, T), bool))

    heads = []
    for h in range(NH):
        q = xn @ params["wq"][h]
        k = xn @ params["wk"][h]
        v = xn @ params["wv"][h]
        wei = (q @ jnp.swapaxes(k, -1, -2)) / (C ** 0.5)
        wei = jnp.where(causal, wei, -jnp.inf)
        wei = jax.nn.softmax(wei, axis=-1)
        heads.append(wei @ v)
    attn = jnp.concatenate(heads, axis=-1) @ params["wp"] + params["bp"]
    x1 = x + attn

    xn2 = ln(x1, params["ln2_g"], params["ln2_b"])
    ff = jnp.maximum(xn2 @ params["w1"] + params["b1"], 0.0) @ params["w2"] + params["b2"]
    return x1 + ff


# ---------------------------------------------------------------------------
# Parameter init (deterministic, PyTorch-Linear-style uniform bounds)
# ---------------------------------------------------------------------------
def init_params(key, n_embed, n_heads_arg):
    # Faithful to the reference Block.__init__ argument swap:
    head_size_eff = n_heads_arg                # size of each head
    num_heads_eff = n_embed // n_heads_arg     # number of heads
    assert num_heads_eff * head_size_eff == n_embed

    ks = jax.random.split(key, 12)
    u = lambda k, shape, bound: jax.random.uniform(k, shape, jnp.float32, -bound, bound)
    bc = 1.0 / np.sqrt(n_embed)
    bh = 1.0 / np.sqrt(4 * n_embed)

    params = {
        "ln1_g": 1.0 + 0.1 * u(ks[0], (1, n_embed), 1.0),
        "ln1_b": 0.1 * u(ks[1], (1, n_embed), 1.0),
        "wq": u(ks[2], (num_heads_eff, n_embed, head_size_eff), bc),
        "wk": u(ks[3], (num_heads_eff, n_embed, head_size_eff), bc),
        "wv": u(ks[4], (num_heads_eff, n_embed, head_size_eff), bc),
        "wp": u(ks[5], (n_embed, n_embed), bc),
        "bp": u(ks[6], (1, n_embed), bc),
        "ln2_g": 1.0 + 0.1 * u(ks[7], (1, n_embed), 1.0),
        "ln2_b": 0.1 * u(ks[8], (1, n_embed), 1.0),
        "w1": u(ks[9], (n_embed, 4 * n_embed), bc),
        "b1": u(ks[10], (1, 4 * n_embed), bc),
        "w2": u(ks[11], (4 * n_embed, n_embed), bh),
        "b2": 0.01 * jnp.ones((1, n_embed), jnp.float32),
    }
    return params


# ---------------------------------------------------------------------------
if __name__ == "__main__":
    # Small shapes consistent with the module (scaled-down n_embed / block_size).
    B, T = 2, 16
    N_EMBED, N_HEADS = 32, 4     # Block(32, 4) -> 8 effective heads of size 4

    key = jax.random.PRNGKey(0)
    kx, kp = jax.random.split(key)
    x = jax.random.normal(kx, (B, T, N_EMBED), jnp.float32)
    params = init_params(kp, N_EMBED, N_HEADS)

    out = jax.block_until_ready(block_forward(x, params))
    ref = jax.block_until_ready(block_reference(x, params))

    # bf16 matmul operands + approx reciprocal introduce small drift vs the f32 reference.
    if not np.allclose(np.asarray(out), np.asarray(ref), rtol=2e-2, atol=2e-2):
        err = float(np.max(np.abs(np.asarray(out) - np.asarray(ref))))
        raise AssertionError(
            f"Pallas kernel output does not match JAX reference (max abs err {err:.3e})")
    print("KERNEL_OK")
</pallas_src>

<mosaic_0001>
module attributes {stable_mosaic.version = 11 : i64} {
  func.func @block_kernel(%arg0: i32, %arg1: memref<16x32xf32, #tpu.memory_space<vmem>>, %arg2: memref<1x32xf32, #tpu.memory_space<vmem>>, %arg3: memref<1x32xf32, #tpu.memory_space<vmem>>, %arg4: memref<32x96xbf16, #tpu.memory_space<vmem>>, %arg5: memref<32x32xbf16, #tpu.memory_space<vmem>>, %arg6: memref<1x32xf32, #tpu.memory_space<vmem>>, %arg7: memref<1x32xf32, #tpu.memory_space<vmem>>, %arg8: memref<1x32xf32, #tpu.memory_space<vmem>>, %arg9: memref<32x128xbf16, #tpu.memory_space<vmem>>, %arg10: memref<1x128xf32, #tpu.memory_space<vmem>>, %arg11: memref<128x32xbf16, #tpu.memory_space<vmem>>, %arg12: memref<1x32xf32, #tpu.memory_space<vmem>>, %arg13: memref<16x32xf32, #tpu.memory_space<vmem>>) attributes {dimension_semantics = [#tpu.dimension_semantics<parallel>], iteration_bounds = array<i64: 2>, scalar_prefetch = 0 : i64, scratch_operands = 0 : i64, tpu.core_type = #tpu.core_type<tc>, window_params = [{transform_indices = @transform_0, window_bounds = array<i64: 16, 32>}, {pipeline_mode = #tpu.pipeline_mode<synchronous>, transform_indices = @transform_1, window_bounds = array<i64: 1, 32>}, {pipeline_mode = #tpu.pipeline_mode<synchronous>, transform_indices = @transform_2, window_bounds = array<i64: 1, 32>}, {pipeline_mode = #tpu.pipeline_mode<synchronous>, transform_indices = @transform_3, window_bounds = array<i64: 32, 96>}, {pipeline_mode = #tpu.pipeline_mode<synchronous>, transform_indices = @transform_4, window_bounds = array<i64: 32, 32>}, {pipeline_mode = #tpu.pipeline_mode<synchronous>, transform_indices = @transform_5, window_bounds = array<i64: 1, 32>}, {pipeline_mode = #tpu.pipeline_mode<synchronous>, transform_indices = @transform_6, window_bounds = array<i64: 1, 32>}, {pipeline_mode = #tpu.pipeline_mode<synchronous>, transform_indices = @transform_7, window_bounds = array<i64: 1, 32>}, {pipeline_mode = #tpu.pipeline_mode<synchronous>, transform_indices = @transform_8, window_bounds = array<i64: 32, 128>}, {pipeline_mode = #tpu.pipeline_mode<synchronous>, transform_indices = @transform_9, window_bounds = array<i64: 1, 128>}, {pipeline_mode = #tpu.pipeline_mode<synchronous>, transform_indices = @transform_10, window_bounds = array<i64: 128, 32>}, {pipeline_mode = #tpu.pipeline_mode<synchronous>, transform_indices = @transform_11, window_bounds = array<i64: 1, 32>}, {transform_indices = @transform_12, window_bounds = array<i64: 16, 32>}]} {
    %c0 = arith.constant 0 : index
    %c0_0 = arith.constant 0 : index
    %0 = vector.load %arg1[%c0, %c0_0] : memref<16x32xf32, #tpu.memory_space<vmem>>, vector<16x32xf32>
    %c0_1 = arith.constant 0 : index
    %c0_2 = arith.constant 0 : index
    %1 = vector.load %arg2[%c0_1, %c0_2] : memref<1x32xf32, #tpu.memory_space<vmem>>, vector<1x32xf32>
    %c0_3 = arith.constant 0 : index
    %c0_4 = arith.constant 0 : index
    %2 = vector.load %arg3[%c0_3, %c0_4] : memref<1x32xf32, #tpu.memory_space<vmem>>, vector<1x32xf32>
    %cst = arith.constant dense<0.000000e+00> : vector<16xf32>
    %3 = vector.multi_reduction <add>, %0, %cst [1] : vector<16x32xf32> to vector<16xf32>
    %4 = vector.shape_cast %3 : vector<16xf32> to vector<16x1xf32>
    %cst_5 = arith.constant 3.200000e+01 : f32
    %5 = vector.broadcast %cst_5 : f32 to vector<16x1xf32>
    %6 = arith.divf %4, %5 : vector<16x1xf32>
    %7 = vector.broadcast %6 : vector<16x1xf32> to vector<16x32xf32>
    %8 = arith.subf %0, %7 : vector<16x32xf32>
    %9 = arith.mulf %8, %8 : vector<16x32xf32>
    %cst_6 = arith.constant dense<0.000000e+00> : vector<16xf32>
    %10 = vector.multi_reduction <add>, %9, %cst_6 [1] : vector<16x32xf32> to vector<16xf32>
    %11 = vector.shape_cast %10 : vector<16xf32> to vector<16x1xf32>
    %cst_7 = arith.constant 3.200000e+01 : f32
    %12 = vector.broadcast %cst_7 : f32 to vector<16x1xf32>
    %13 = arith.divf %11, %12 : vector<16x1xf32>
    %14 = vector.broadcast %6 : vector<16x1xf32> to vector<16x32xf32>
    %15 = arith.subf %0, %14 : vector<16x32xf32>
    %cst_8 = arith.constant 9.99999974E-6 : f32
    %16 = vector.broadcast %cst_8 : f32 to vector<16x1xf32>
    %17 = arith.addf %13, %16 : vector<16x1xf32>
    %18 = math.rsqrt %17 : vector<16x1xf32>
    %19 = vector.broadcast %18 : vector<16x1xf32> to vector<16x32xf32>
    %20 = arith.mulf %15, %19 : vector<16x32xf32>
    %21 = vector.broadcast %1 : vector<1x32xf32> to vector<16x32xf32>
    %22 = arith.mulf %20, %21 : vector<16x32xf32>
    %23 = vector.broadcast %2 : vector<1x32xf32> to vector<16x32xf32>
    %24 = arith.addf %22, %23 : vector<16x32xf32>
    %25 = arith.truncf %24 : vector<16x32xf32> to vector<16x32xbf16>
    %c0_9 = arith.constant 0 : index
    %c0_10 = arith.constant 0 : index
    %26 = vector.load %arg4[%c0_9, %c0_10] : memref<32x96xbf16, #tpu.memory_space<vmem>>, vector<32x96xbf16>
    %cst_11 = arith.constant dense<0.000000e+00> : vector<16x96xf32>
    %27 = tpu.matmul %25, %26, %cst_11 {dimension_numbers = #tpu.dot_dimension_numbers<[1], [0], [0], [1], [0, 0, 1, 1], [], []>} : vector<16x32xbf16>, vector<32x96xbf16>, vector<16x96xf32> -> vector<16x96xf32>
    %28 = arith.truncf %27 : vector<16x96xf32> to vector<16x96xbf16>
    %29 = vector.extract_strided_slice %28 {offsets = [0, 0], sizes = [16, 4], strides = [1, 1]} : vector<16x96xbf16> to vector<16x4xbf16>
    %30 = vector.extract_strided_slice %28 {offsets = [0, 4], sizes = [16, 4], strides = [1, 1]} : vector<16x96xbf16> to vector<16x4xbf16>
    %31 = vector.extract_strided_slice %28 {offsets = [0, 8], sizes = [16, 4], strides = [1, 1]} : vector<16x96xbf16> to vector<16x4xbf16>
    %32 = vector.extract_strided_slice %28 {offsets = [0, 12], sizes = [16, 4], strides = [1, 1]} : vector<16x96xbf16> to vector<16x4xbf16>
    %33 = vector.extract_strided_slice %28 {offsets = [0, 16], sizes = [16, 4], strides = [1, 1]} : vector<16x96xbf16> to vector<16x4xbf16>
    %34 = vector.extract_strided_slice %28 {offsets = [0, 20], sizes = [16, 4], strides = [1, 1]} : vector<16x96xbf16> to vector<16x4xbf16>
    %35 = vector.extract_strided_slice %28 {offsets = [0, 24], sizes = [16, 4], strides = [1, 1]} : vector<16x96xbf16> to vector<16x4xbf16>
    %36 = vector.extract_strided_slice %28 {offsets = [0, 28], sizes = [16, 4], strides = [1, 1]} : vector<16x96xbf16> to vector<16x4xbf16>
    %37 = vector.shape_cast %29 : vector<16x4xbf16> to vector<1x16x4xbf16>
    %38 = vector.shape_cast %30 : vector<16x4xbf16> to vector<1x16x4xbf16>
    %39 = vector.shape_cast %31 : vector<16x4xbf16> to vector<1x16x4xbf16>
    %40 = vector.shape_cast %32 : vector<16x4xbf16> to vector<1x16x4xbf16>
    %41 = vector.shape_cast %33 : vector<16x4xbf16> to vector<1x16x4xbf16>
    %42 = vector.shape_cast %34 : vector<16x4xbf16> to vector<1x16x4xbf16>
    %43 = vector.shape_cast %35 : vector<16x4xbf16> to vector<1x16x4xbf16>
    %44 = vector.shape_cast %36 : vector<16x4xbf16> to vector<1x16x4xbf16>
    %45 = tpu.concatenate %37, %38, %39, %40, %41, %42, %43, %44 in 0 : vector<1x16x4xbf16>, vector<1x16x4xbf16>, vector<1x16x4xbf16>, vector<1x16x4xbf16>, vector<1x16x4xbf16>, vector<1x16x4xbf16>, vector<1x16x4xbf16>, vector<1x16x4xbf16> -> vector<8x16x4xbf16>
    %46 = vector.extract_strided_slice %28 {offsets = [0, 32], sizes = [16, 4], strides = [1, 1]} : vector<16x96xbf16> to vector<16x4xbf16>
    %47 = vector.extract_strided_slice %28 {offsets = [0, 36], sizes = [16, 4], strides = [1, 1]} : vector<16x96xbf16> to vector<16x4xbf16>
    %48 = vector.extract_strided_slice %28 {offsets = [0, 40], sizes = [16, 4], strides = [1, 1]} : vector<16x96xbf16> to vector<16x4xbf16>
    %49 = vector.extract_strided_slice %28 {offsets = [0, 44], sizes = [16, 4], strides = [1, 1]} : vector<16x96xbf16> to vector<16x4xbf16>
    %50 = vector.extract_strided_slice %28 {offsets = [0, 48], sizes = [16, 4], strides = [1, 1]} : vector<16x96xbf16> to vector<16x4xbf16>
    %51 = vector.extract_strided_slice %28 {offsets = [0, 52], sizes = [16, 4], strides = [1, 1]} : vector<16x96xbf16> to vector<16x4xbf16>
    %52 = vector.extract_strided_slice %28 {offsets = [0, 56], sizes = [16, 4], strides = [1, 1]} : vector<16x96xbf16> to vector<16x4xbf16>
    %53 = vector.extract_strided_slice %28 {offsets = [0, 60], sizes = [16, 4], strides = [1, 1]} : vector<16x96xbf16> to vector<16x4xbf16>
    %54 = vector.shape_cast %46 : vector<16x4xbf16> to vector<1x16x4xbf16>
    %55 = vector.shape_cast %47 : vector<16x4xbf16> to vector<1x16x4xbf16>
    %56 = vector.shape_cast %48 : vector<16x4xbf16> to vector<1x16x4xbf16>
    %57 = vector.shape_cast %49 : vector<16x4xbf16> to vector<1x16x4xbf16>
    %58 = vector.shape_cast %50 : vector<16x4xbf16> to vector<1x16x4xbf16>
    %59 = vector.shape_cast %51 : vector<16x4xbf16> to vector<1x16x4xbf16>
    %60 = vector.shape_cast %52 : vector<16x4xbf16> to vector<1x16x4xbf16>
    %61 = vector.shape_cast %53 : vector<16x4xbf16> to vector<1x16x4xbf16>
    %62 = tpu.concatenate %54, %55, %56, %57, %58, %59, %60, %61 in 0 : vector<1x16x4xbf16>, vector<1x16x4xbf16>, vector<1x16x4xbf16>, vector<1x16x4xbf16>, vector<1x16x4xbf16>, vector<1x16x4xbf16>, vector<1x16x4xbf16>, vector<1x16x4xbf16> -> vector<8x16x4xbf16>
    %63 = vector.extract_strided_slice %28 {offsets = [0, 64], sizes = [16, 4], strides = [1, 1]} : vector<16x96xbf16> to vector<16x4xbf16>
    %64 = vector.extract_strided_slice %28 {offsets = [0, 68], sizes = [16, 4], strides = [1, 1]} : vector<16x96xbf16> to vector<16x4xbf16>
    %65 = vector.extract_strided_slice %28 {offsets = [0, 72], sizes = [16, 4], strides = [1, 1]} : vector<16x96xbf16> to vector<16x4xbf16>
    %66 = vector.extract_strided_slice %28 {offsets = [0, 76], sizes = [16, 4], strides = [1, 1]} : vector<16x96xbf16> to vector<16x4xbf16>
    %67 = vector.extract_strided_slice %28 {offsets = [0, 80], sizes = [16, 4], strides = [1, 1]} : vector<16x96xbf16> to vector<16x4xbf16>
    %68 = vector.extract_strided_slice %28 {offsets = [0, 84], sizes = [16, 4], strides = [1, 1]} : vector<16x96xbf16> to vector<16x4xbf16>
    %69 = vector.extract_strided_slice %28 {offsets = [0, 88], sizes = [16, 4], strides = [1, 1]} : vector<16x96xbf16> to vector<16x4xbf16>
    %70 = vector.extract_strided_slice %28 {offsets = [0, 92], sizes = [16, 4], strides = [1, 1]} : vector<16x96xbf16> to vector<16x4xbf16>
    %71 = vector.shape_cast %63 : vector<16x4xbf16> to vector<1x16x4xbf16>
    %72 = vector.shape_cast %64 : vector<16x4xbf16> to vector<1x16x4xbf16>
    %73 = vector.shape_cast %65 : vector<16x4xbf16> to vector<1x16x4xbf16>
    %74 = vector.shape_cast %66 : vector<16x4xbf16> to vector<1x16x4xbf16>
    %75 = vector.shape_cast %67 : vector<16x4xbf16> to vector<1x16x4xbf16>
    %76 = vector.shape_cast %68 : vector<16x4xbf16> to vector<1x16x4xbf16>
    %77 = vector.shape_cast %69 : vector<16x4xbf16> to vector<1x16x4xbf16>
    %78 = vector.shape_cast %70 : vector<16x4xbf16> to vector<1x16x4xbf16>
    %79 = tpu.concatenate %71, %72, %73, %74, %75, %76, %77, %78 in 0 : vector<1x16x4xbf16>, vector<1x16x4xbf16>, vector<1x16x4xbf16>, vector<1x16x4xbf16>, vector<1x16x4xbf16>, vector<1x16x4xbf16>, vector<1x16x4xbf16>, vector<1x16x4xbf16> -> vector<8x16x4xbf16>
    %80 = tpu.iota {dimensions = array<i32: 0>} : vector<16x16xi32>
    %81 = tpu.iota {dimensions = array<i32: 1>} : vector<16x16xi32>
    %82 = arith.cmpi sle, %81, %80 : vector<16x16xi32>
    %83 = vector.shape_cast %82 : vector<16x16xi1> to vector<1x16x16xi1>
    "tpu.trace_start"() <{level = 10 : i32, message = "hqd,hkd->hqk"}> : () -> ()
    %cst_12 = arith.constant dense<0.000000e+00> : vector<8x16x16xf32>
    %84 = tpu.matmul %45, %62, %cst_12 {dimension_numbers = #tpu.dot_dimension_numbers<[2], [2], [1], [1], [0, 0, 0, 1, 1, 1], [0], [0]>} : vector<8x16x4xbf16>, vector<8x16x4xbf16>, vector<8x16x16xf32> -> vector<8x16x16xf32>
    %cst_13 = arith.constant 0xFF800000 : f32
    "tpu.trace_stop"() : () -> ()
    %85 = vector.shape_cast %83 : vector<1x16x16xi1> to vector<1x16x16xi1>
    %86 = vector.broadcast %85 : vector<1x16x16xi1> to vector<8x16x16xi1>
    %87 = vector.broadcast %cst_13 : f32 to vector<8x16x16xf32>
    %88 = arith.select %86, %84, %87 : vector<8x16x16xi1>, vector<8x16x16xf32>
    %cst_14 = arith.constant dense<0xFF800000> : vector<8x16xf32>
    %89 = vector.multi_reduction <maximumf>, %88, %cst_14 [2] : vector<8x16x16xf32> to vector<8x16xf32>
    %90 = vector.shape_cast %89 : vector<8x16xf32> to vector<8x16x1xf32>
    %91 = vector.broadcast %90 : vector<8x16x1xf32> to vector<8x16x16xf32>
    %92 = arith.subf %88, %91 : vector<8x16x16xf32>
    %93 = math.exp %92 : vector<8x16x16xf32>
    %cst_15 = arith.constant dense<0.000000e+00> : vector<8x16xf32>
    %94 = vector.multi_reduction <add>, %93, %cst_15 [2] : vector<8x16x16xf32> to vector<8x16xf32>
    %95 = vector.shape_cast %94 : vector<8x16xf32> to vector<8x16x1xf32>
    %96 = tpu.reciprocal %95 {approx = true} : vector<8x16x1xf32> -> vector<8x16x1xf32>
    %97 = vector.broadcast %96 : vector<8x16x1xf32> to vector<8x16x16xf32>
    %98 = arith.mulf %93, %97 : vector<8x16x16xf32>
    %99 = arith.truncf %98 : vector<8x16x16xf32> to vector<8x16x16xbf16>
    "tpu.trace_start"() <{level = 10 : i32, message = "hqk,hkd->hqd"}> : () -> ()
    %cst_16 = arith.constant dense<0.000000e+00> : vector<8x16x4xf32>
    %100 = tpu.matmul %99, %79, %cst_16 {dimension_numbers = #tpu.dot_dimension_numbers<[2], [1], [1], [2], [0, 0, 0, 1, 1, 2], [0], [0]>} : vector<8x16x16xbf16>, vector<8x16x4xbf16>, vector<8x16x4xf32> -> vector<8x16x4xf32>
    "tpu.trace_stop"() : () -> ()
    %101 = vector.extract_strided_slice %100 {offsets = [0, 0, 0], sizes = [1, 16, 4], strides = [1, 1, 1]} : vector<8x16x4xf32> to vector<1x16x4xf32>
    %102 = vector.shape_cast %101 : vector<1x16x4xf32> to vector<16x4xf32>
    %103 = vector.extract_strided_slice %100 {offsets = [1, 0, 0], sizes = [1, 16, 4], strides = [1, 1, 1]} : vector<8x16x4xf32> to vector<1x16x4xf32>
    %104 = vector.shape_cast %103 : vector<1x16x4xf32> to vector<16x4xf32>
    %105 = vector.extract_strided_slice %100 {offsets = [2, 0, 0], sizes = [1, 16, 4], strides = [1, 1, 1]} : vector<8x16x4xf32> to vector<1x16x4xf32>
    %106 = vector.shape_cast %105 : vector<1x16x4xf32> to vector<16x4xf32>
    %107 = vector.extract_strided_slice %100 {offsets = [3, 0, 0], sizes = [1, 16, 4], strides = [1, 1, 1]} : vector<8x16x4xf32> to vector<1x16x4xf32>
    %108 = vector.shape_cast %107 : vector<1x16x4xf32> to vector<16x4xf32>
    %109 = vector.extract_strided_slice %100 {offsets = [4, 0, 0], sizes = [1, 16, 4], strides = [1, 1, 1]} : vector<8x16x4xf32> to vector<1x16x4xf32>
    %110 = vector.shape_cast %109 : vector<1x16x4xf32> to vector<16x4xf32>
    %111 = vector.extract_strided_slice %100 {offsets = [5, 0, 0], sizes = [1, 16, 4], strides = [1, 1, 1]} : vector<8x16x4xf32> to vector<1x16x4xf32>
    %112 = vector.shape_cast %111 : vector<1x16x4xf32> to vector<16x4xf32>
    %113 = vector.extract_strided_slice %100 {offsets = [6, 0, 0], sizes = [1, 16, 4], strides = [1, 1, 1]} : vector<8x16x4xf32> to vector<1x16x4xf32>
    %114 = vector.shape_cast %113 : vector<1x16x4xf32> to vector<16x4xf32>
    %115 = vector.extract_strided_slice %100 {offsets = [7, 0, 0], sizes = [1, 16, 4], strides = [1, 1, 1]} : vector<8x16x4xf32> to vector<1x16x4xf32>
    %116 = vector.shape_cast %115 : vector<1x16x4xf32> to vector<16x4xf32>
    %117 = tpu.concatenate %102, %104, %106, %108, %110, %112, %114, %116 in 1 : vector<16x4xf32>, vector<16x4xf32>, vector<16x4xf32>, vector<16x4xf32>, vector<16x4xf32>, vector<16x4xf32>, vector<16x4xf32>, vector<16x4xf32> -> vector<16x32xf32>
    %118 = arith.truncf %117 : vector<16x32xf32> to vector<16x32xbf16>
    %c0_17 = arith.constant 0 : index
    %c0_18 = arith.constant 0 : index
    %119 = vector.load %arg5[%c0_17, %c0_18] : memref<32x32xbf16, #tpu.memory_space<vmem>>, vector<32x32xbf16>
    %cst_19 = arith.constant dense<0.000000e+00> : vector<16x32xf32>
    %120 = tpu.matmul %118, %119, %cst_19 {dimension_numbers = #tpu.dot_dimension_numbers<[1], [0], [0], [1], [0, 0, 1, 1], [], []>} : vector<16x32xbf16>, vector<32x32xbf16>, vector<16x32xf32> -> vector<16x32xf32>
    %c0_20 = arith.constant 0 : index
    %c0_21 = arith.constant 0 : index
    %121 = vector.load %arg6[%c0_20, %c0_21] : memref<1x32xf32, #tpu.memory_space<vmem>>, vector<1x32xf32>
    %122 = vector.broadcast %121 : vector<1x32xf32> to vector<16x32xf32>
    %123 = arith.addf %120, %122 : vector<16x32xf32>
    %124 = arith.addf %0, %123 : vector<16x32xf32>
    %c0_22 = arith.constant 0 : index
    %c0_23 = arith.constant 0 : index
    %125 = vector.load %arg7[%c0_22, %c0_23] : memref<1x32xf32, #tpu.memory_space<vmem>>, vector<1x32xf32>
    %c0_24 = arith.constant 0 : index
    %c0_25 = arith.constant 0 : index
    %126 = vector.load %arg8[%c0_24, %c0_25] : memref<1x32xf32, #tpu.memory_space<vmem>>, vector<1x32xf32>
    %cst_26 = arith.constant dense<0.000000e+00> : vector<16xf32>
    %127 = vector.multi_reduction <add>, %124, %cst_26 [1] : vector<16x32xf32> to vector<16xf32>
    %128 = vector.shape_cast %127 : vector<16xf32> to vector<16x1xf32>
    %cst_27 = arith.constant 3.200000e+01 : f32
    %129 = vector.broadcast %cst_27 : f32 to vector<16x1xf32>
    %130 = arith.divf %128, %129 : vector<16x1xf32>
    %131 = vector.broadcast %130 : vector<16x1xf32> to vector<16x32xf32>
    %132 = arith.subf %124, %131 : vector<16x32xf32>
    %133 = arith.mulf %132, %132 : vector<16x32xf32>
    %cst_28 = arith.constant dense<0.000000e+00> : vector<16xf32>
    %134 = vector.multi_reduction <add>, %133, %cst_28 [1] : vector<16x32xf32> to vector<16xf32>
    %135 = vector.shape_cast %134 : vector<16xf32> to vector<16x1xf32>
    %cst_29 = arith.constant 3.200000e+01 : f32
    %136 = vector.broadcast %cst_29 : f32 to vector<16x1xf32>
    %137 = arith.divf %135, %136 : vector<16x1xf32>
    %138 = vector.broadcast %130 : vector<16x1xf32> to vector<16x32xf32>
    %139 = arith.subf %124, %138 : vector<16x32xf32>
    %cst_30 = arith.constant 9.99999974E-6 : f32
    %140 = vector.broadcast %cst_30 : f32 to vector<16x1xf32>
    %141 = arith.addf %137, %140 : vector<16x1xf32>
    %142 = math.rsqrt %141 : vector<16x1xf32>
    %143 = vector.broadcast %142 : vector<16x1xf32> to vector<16x32xf32>
    %144 = arith.mulf %139, %143 : vector<16x32xf32>
    %145 = vector.broadcast %125 : vector<1x32xf32> to vector<16x32xf32>
    %146 = arith.mulf %144, %145 : vector<16x32xf32>
    %147 = vector.broadcast %126 : vector<1x32xf32> to vector<16x32xf32>
    %148 = arith.addf %146, %147 : vector<16x32xf32>
    %149 = arith.truncf %148 : vector<16x32xf32> to vector<16x32xbf16>
    %c0_31 = arith.constant 0 : index
    %c0_32 = arith.constant 0 : index
    %150 = vector.load %arg9[%c0_31, %c0_32] : memref<32x128xbf16, #tpu.memory_space<vmem>>, vector<32x128xbf16>
    %cst_33 = arith.constant dense<0.000000e+00> : vector<16x128xf32>
    %151 = tpu.matmul %149, %150, %cst_33 {dimension_numbers = #tpu.dot_dimension_numbers<[1], [0], [0], [1], [0, 0, 1, 1], [], []>} : vector<16x32xbf16>, vector<32x128xbf16>, vector<16x128xf32> -> vector<16x128xf32>
    %c0_34 = arith.constant 0 : index
    %c0_35 = arith.constant 0 : index
    %152 = vector.load %arg10[%c0_34, %c0_35] : memref<1x128xf32, #tpu.memory_space<vmem>>, vector<1x128xf32>
    %153 = vector.broadcast %152 : vector<1x128xf32> to vector<16x128xf32>
    %154 = arith.addf %151, %153 : vector<16x128xf32>
    %cst_36 = arith.constant 0.000000e+00 : f32
    %155 = vector.broadcast %cst_36 : f32 to vector<16x128xf32>
    %156 = arith.maximumf %154, %155 : vector<16x128xf32>
    %157 = arith.truncf %156 : vector<16x128xf32> to vector<16x128xbf16>
    %c0_37 = arith.constant 0 : index
    %c0_38 = arith.constant 0 : index
    %158 = vector.load %arg11[%c0_37, %c0_38] : memref<128x32xbf16, #tpu.memory_space<vmem>>, vector<128x32xbf16>
    %cst_39 = arith.constant dense<0.000000e+00> : vector<16x32xf32>
    %159 = tpu.matmul %157, %158, %cst_39 {dimension_numbers = #tpu.dot_dimension_numbers<[1], [0], [0], [1], [0, 0, 1, 1], [], []>} : vector<16x128xbf16>, vector<128x32xbf16>, vector<16x32xf32> -> vector<16x32xf32>
    %c0_40 = arith.constant 0 : index
    %c0_41 = arith.constant 0 : index
    %160 = vector.load %arg12[%c0_40, %c0_41] : memref<1x32xf32, #tpu.memory_space<vmem>>, vector<1x32xf32>
    %161 = vector.broadcast %160 : vector<1x32xf32> to vector<16x32xf32>
    %162 = arith.addf %159, %161 : vector<16x32xf32>
    %163 = arith.addf %124, %162 : vector<16x32xf32>
    %c0_42 = arith.constant 0 : index
    %c0_43 = arith.constant 0 : index
    %164 = vector.load %arg13[%c0_42, %c0_43] : memref<16x32xf32, #tpu.memory_space<vmem>>, vector<16x32xf32>
    tpu.vector_store %arg13[%c0_42, %c0_43], %163 {strides = array<i32>} : memref<16x32xf32, #tpu.memory_space<vmem>>, vector<16x32xf32>,
    return
  }
  func.func @transform_0(%arg0: i32) -> (i32, i32) {
    %c0_i32 = arith.constant 0 : i32
    %c0_i32_0 = arith.constant 0 : i32
    return %arg0, %c0_i32 : i32, i32
  }
  func.func @transform_1(%arg0: i32) -> (i32, i32) {
    %c0_i32 = arith.constant 0 : i32
    %c0_i32_0 = arith.constant 0 : i32
    %c0_i32_1 = arith.constant 0 : i32
    return %c0_i32, %c0_i32_0 : i32, i32
  }
  func.func @transform_2(%arg0: i32) -> (i32, i32) {
    %c0_i32 = arith.constant 0 : i32
    %c0_i32_0 = arith.constant 0 : i32
    %c0_i32_1 = arith.constant 0 : i32
    return %c0_i32, %c0_i32_0 : i32, i32
  }
  func.func @transform_3(%arg0: i32) -> (i32, i32) {
    %c0_i32 = arith.constant 0 : i32
    %c0_i32_0 = arith.constant 0 : i32
    %c0_i32_1 = arith.constant 0 : i32
    return %c0_i32, %c0_i32_0 : i32, i32
  }
  func.func @transform_4(%arg0: i32) -> (i32, i32) {
    %c0_i32 = arith.constant 0 : i32
    %c0_i32_0 = arith.constant 0 : i32
    %c0_i32_1 = arith.constant 0 : i32
    return %c0_i32, %c0_i32_0 : i32, i32
  }
  func.func @transform_5(%arg0: i32) -> (i32, i32) {
    %c0_i32 = arith.constant 0 : i32
    %c0_i32_0 = arith.constant 0 : i32
    %c0_i32_1 = arith.constant 0 : i32
    return %c0_i32, %c0_i32_0 : i32, i32
  }
  func.func @transform_6(%arg0: i32) -> (i32, i32) {
    %c0_i32 = arith.constant 0 : i32
    %c0_i32_0 = arith.constant 0 : i32
    %c0_i32_1 = arith.constant 0 : i32
    return %c0_i32, %c0_i32_0 : i32, i32
  }
  func.func @transform_7(%arg0: i32) -> (i32, i32) {
    %c0_i32 = arith.constant 0 : i32
    %c0_i32_0 = arith.constant 0 : i32
    %c0_i32_1 = arith.constant 0 : i32
    return %c0_i32, %c0_i32_0 : i32, i32
  }
  func.func @transform_8(%arg0: i32) -> (i32, i32) {
    %c0_i32 = arith.constant 0 : i32
    %c0_i32_0 = arith.constant 0 : i32
    %c0_i32_1 = arith.constant 0 : i32
    return %c0_i32, %c0_i32_0 : i32, i32
  }
  func.func @transform_9(%arg0: i32) -> (i32, i32) {
    %c0_i32 = arith.constant 0 : i32
    %c0_i32_0 = arith.constant 0 : i32
    %c0_i32_1 = arith.constant 0 : i32
    return %c0_i32, %c0_i32_0 : i32, i32
  }
  func.func @transform_10(%arg0: i32) -> (i32, i32) {
    %c0_i32 = arith.constant 0 : i32
    %c0_i32_0 = arith.constant 0 : i32
    %c0_i32_1 = arith.constant 0 : i32
    return %c0_i32, %c0_i32_0 : i32, i32
  }
  func.func @transform_11(%arg0: i32) -> (i32, i32) {
    %c0_i32 = arith.constant 0 : i32
    %c0_i32_0 = arith.constant 0 : i32
    %c0_i32_1 = arith.constant 0 : i32
    return %c0_i32, %c0_i32_0 : i32, i32
  }
  func.func @transform_12(%arg0: i32) -> (i32, i32) {
    %c0_i32 = arith.constant 0 : i32
    %c0_i32_0 = arith.constant 0 : i32
    return %arg0, %c0_i32 : i32, i32
  }
}

</mosaic_0001>

<bundles_post_ra>
// kernel: block_forward.1
= control target key start
LH: loop header
LB: loop body
LE: loop exit
PB: predicated region body
PF: predicated region fallthrough
CT: control target
= control target key end

     0   :  { %s3095_s0 = inlined_call_operand.vmem [shape: f32[32,32], index: 0, kind: input, shape index: {}]   ;;  %s3096_s1 = inlined_call_operand.vmem [shape: f32[1,32], index: 1, kind: input, shape index: {}]   ;;  %s3097_s2 = inlined_call_operand.vmem [shape: f32[1,32], index: 2, kind: input, shape index: {}]   ;;  %s3098_s3 = inlined_call_operand.vmem [shape: bf16[32,96], index: 3, kind: input, shape index: {}]   ;;  %s3099_s4 = inlined_call_operand.vmem [shape: bf16[32,32], index: 4, kind: input, shape index: {}]   ;;  %s3100_s5 = inlined_call_operand.vmem [shape: f32[1,32], index: 5, kind: input, shape index: {}]   ;;  %s3101_s6 = inlined_call_operand.vmem [shape: f32[1,32], index: 6, kind: input, shape index: {}]   ;;  %s3102_s7 = inlined_call_operand.vmem [shape: f32[1,32], index: 7, kind: input, shape index: {}]   ;;  %s3103_s8 = inlined_call_operand.vmem [shape: bf16[32,128], index: 8, kind: input, shape index: {}]   ;;  %s3104_s9 = inlined_call_operand.vmem [shape: f32[1,128], index: 9, kind: input, shape index: {}]   ;;  %s3105_s10 = inlined_call_operand.vmem [shape: bf16[128,32], index: 10, kind: input, shape index: {}]   ;;  %s3106_s11 = inlined_call_operand.vmem [shape: f32[1,32], index: 11, kind: input, shape index: {}]   ;;  %s3107_s12 = inlined_call_operand.hbm [shape: f32[32,32], index: 12, kind: output, shape index: {}]  }
   0x1   :  { %3109 = sst [smem:[#allocation5_spill]] %s3095_s0 }
   0x2   :  { %3110 = sst [smem:[#allocation6_spill]] %s3096_s1 }
   0x3   :  { %17 = vsyncpa [#allocation3], 0 }
   0x4   :  { %19 = vsyncpa [#allocation3 + $0x1], 0  ;;  %s2547_s21 = smov 0   ;;  %s2549_s22 = smov 0  }
   0x5   :  { %s2551_s23 = smov 0   ;;  %s2553_s24 = smov 0  }
   0x6 LB: > { %s2568_s25 = sadd.s32 4294967295, %s2460_s24   ;;  %s1974_s26 = sadd.s32 4294967294, %s2460_s24   ;;  %s2460_s24 = sphi %s2553_s24, %s3123_s24   ;;  %s2456_s23 = sphi %s2551_s23, %s3122_s23   ;;  %s2452_s22 = sphi %s2549_s22, %s3121_s22   ;;  %s2448_s21 = sphi %s2547_s21, %s3120_s21  }
   0x7   : > { %s2572_s27 = sadd.s32 1, %s2460_s24   ;;  %s289_s28 = sadd.s32 1, %s2456_s23 }
   0x8   : > { %s286_s29 = ssub.s32 %s2460_s24, %s2572_s27  ;;  %p299_p0 = scmp.ne.s32.totalorder %s2456_s23, %s2452_s22 }
   0x9   : > { %p287_p1 = scmp.eq.s32.totalorder %s286_s29, 0  ;;  %p300_p2 = scmp.eq.s32.totalorder %s2568_s25, 1 }
   0xa   : > { %p305_p3 = scmp.ne.s32.totalorder %s2452_s22, %s2448_s21  ;;  %p306_p4 = scmp.eq.s32.totalorder %s1974_s26, 1 }
   0xb   : > { %s2583_s30 = scalar_select %p287_p1, %s2456_s23, %s289_s28  }
   0xc   : > { %p2585_p5 = por %p300_p2, %p299_p0  ;;  %p2589_p6 = por %p306_p4, %p305_p3 }
   0xd   : > { %p1977_p7 = scmp.ge.s32.totalorder %s2460_s24, 1  ;;  %p366_p8 = scmp.lt.s32.totalorder %s2460_s24, 3 }
   0xf   : > { %p367_p9 = pnand %p1977_p7, %p366_p8 }
  0x10   : > { %s1979_s15 = sshll.u32 (!%p367_p9), %s2568_s25, 1  ;;  %vm420_vm0 = vcmask (!%p367_p9), 261120   ;;  %s3113_s0 = sld [smem:[#allocation5_spill]] (!%p367_p9)  ;;  %v2310_v14 = vld [vmem:[%s3098_s3] sm:$0xff] (!%p367_p9)   ;;  %v2462_v15 = vmov (!%p367_p9), 0.0   ;;  %v2311_v16 = vld [vmem:[%s3098_s3 + $0x8] sm:$0xff] (!%p367_p9)   ;;  %v541_v63 = vlaneseq (!%p367_p9) }
  0x11   : > { %370 = sbr.rel (%p367_p9) target bundleno = 2683 (0xa7b), region = 68  ;;  %p409_p10 = scmp.lt.s32.totalorder (!%p367_p9), %s1979_s15, 3  ;;  %2077 = vmatprep.subr.bf16.mxu0 (!%p367_p9), %v2462_v15  ;;  %2097 = vmatprep.subr.bf16.mxu1 (!%p367_p9), %v2462_v15  ;;  %vm2463_vm1 = vmmov (!%p367_p9), 0   ;;  %v1982_v29 = vld [vmem:[%s3097_s2] ss:$0 sm:$0xff] (!%p367_p9)  ;;  %vm550_vm2 = vcmask (!%p367_p9), 31744  }
  0x12   : > { %2078 = vmatpush3.bf16.msra.mxu0 (!%p367_p9), %v2310_v14  ;;  %2081 = vmatprep.mubr.msk.bf16.mxu0 (!%p367_p9), %vm2463_vm1, %v2462_v15  ;;  %s3114_s1 = sld [smem:[#allocation6_spill]] (!%p367_p9)  ;;  %s2464_s20 = smov (!%p367_p9), 120   ;;  %vm961_vm4 = vcmask (!%p367_p9), 130048   ;;  %vm1580_vm6 = vcmask (!%p367_p9), 64512   ;;  %vm1583_vm7 = vcmask (!%p367_p9), 97280   ;;  %vm1588_vm8 = vcmask (!%p367_p9), 162816  }
  0x13   : > { %2079 = vmatprep.subr.bf16.mxu0 (!%p367_p9), %v2462_v15  ;;  %2099 = vmatprep.mubr.msk.bf16.mxu1 (!%p367_p9), %vm2463_vm1, %v2462_v15  ;;  %s2465_s26 = smov (!%p367_p9), 124   ;;  %s2466_s28 = smov (!%p367_p9), 116   ;;  %vm1591_vm9 = vcmask (!%p367_p9), 195584   ;;  %vm1594_vm10 = vcmask (!%p367_p9), 228352  }
  0x14   : > { %s2467_s29 = smov (!%p367_p9), 108   ;;  %s2470_s17 = smov (!%p367_p9), 104  }
  0x15   : > { %s2471_s18 = smov (!%p367_p9), 96  }
  0x16   : > { %2080 = vmatpush3.bf16.msra.mxu0 (!%p367_p9), %v2311_v16 }
  0x17   : > { %2085 = vmatprep.subr.bf16.mxu0 (!%p367_p9), %v2462_v15 }
  0x18   : > { %s3125_s15 = smov (!%p409_p10, %s1979_s15), 3  ;;  %v1981_v25 = vld [vmem:[%s3114_s1] ss:$0 sm:$0xff] }
  0x19   : > { %s1980_s16 = sshll.u32 %s3125_s15, 3  ;;  %s2468_s15 = smov 112  }
  0x1a   : > { %s2599_s19 = scalar_lea.vmem %s3113_s0, %s1980_s16  ;;  %s2469_s16 = smov 100  }
  0x1b   : > { %v416_v0 = vld [vmem:[%s2599_s19] sm:$0xff]  ;;  %v417_v1 = vld [vmem:[%s2599_s19 + $0x8] sm:$0xff] }
  0x1c   : > { %v421_v2 = vsel %vm420_vm0, %v416_v0, 0.0  ;;  %v424_v3 = vsel %vm420_vm0, %v417_v1, 0.0 }
  0x1d   : > { %422 = vadd.xlane.f32.xlu0 %v421_v2 }
  0x21   : > { %425 = vadd.xlane.f32.xlu0 %v424_v3 }
  0xaa   : > { %v423_v4 = vpop.xlane.xlu0 %422 }
  0xab   : > { %v428_v5 = vmul.f32 0.03125, %v423_v4 }
  0xad   : > { %v430_v6 = vsub.f32 %v416_v0, %v428_v5  ;;  %v542_v0 = vshrl.u32 %v541_v63, 7 }
  0xae   : > { %v426_v7 = vpop.xlane.xlu0 %425 }
  0xaf   : > { %v429_v8 = vmul.f32 0.03125, %v426_v7  ;;  %v432_v9 = vmul.f32 %v430_v6, %v430_v6  ;;  %v543_v2 = vadd.s32 8, %v542_v0 }
  0xb1   : > { %v431_v10 = vsub.f32 %v417_v1, %v429_v8  ;;  %v434_v11 = vsel %vm420_vm0, %v432_v9, 0.0  ;;  %v545_v1 = vand.u32 127, %v541_v63 }
  0xb2   : > { %435 = vadd.xlane.f32.xlu1 %v434_v11 }
  0xb3   : > { %v433_v12 = vmul.f32 %v431_v10, %v431_v10  ;;  %vm2700_vm3 = vcmp.le.s32.totalorder %v545_v1, %v542_v0  ;;  %vm2704_vm5 = vcmp.le.s32.totalorder %v545_v1, %v543_v2 }
  0xb5   : > { %v437_v13 = vsel %vm420_vm0, %v433_v12, 0.0 }
  0xb6   : > { %438 = vadd.xlane.f32.xlu1 %v437_v13 }
 0x13f   : > { %v436_v17 = vpop.xlane.xlu1 %435 }
 0x140   : > { %v440_v18 = vmul.f32 0.03125, %v436_v17 }
 0x142   : > { %v442_v19 = vadd.f32 1e-05, %v440_v18 }
 0x143   : > { %v439_v20 = vpop.xlane.xlu1 %438 }
 0x144   : > { %2324 = vrsqrt.f32 %v442_v19  ;;  %v441_v21 = vmul.f32 0.03125, %v439_v20 }
 0x146   : > { %v443_v22 = vadd.f32 1e-05, %v441_v21 }
 0x148   : > { %2326 = vrsqrt.f32 %v443_v22 }
 0x14e   : > { %v2325_v23 = vpop.eup %2324 }
 0x14f   : > { %v446_v24 = vmul.f32 %v2325_v23, %v430_v6 }
 0x151   : > { %v454_v28 = vmul.f32 %v1981_v25, %v446_v24 }
 0x152   : > { %v2327_v26 = vpop.eup %2326 }
 0x153   : > { %v447_v27 = vmul.f32 %v2327_v26, %v431_v10  ;;  %v462_v31 = vadd.f32 %v1982_v29, %v454_v28 }
 0x155   : > { %v455_v30 = vmul.f32 %v1981_v25, %v447_v27 }
 0x157   : > { %v463_v32 = vadd.f32 %v1982_v29, %v455_v30 }
 0x159   : > { %v464_v33 = vpack.c.bf16 %v463_v32, %v462_v31 }
 0x15b   : > { %2082 = vmatmul.mubr.msk.bf16.vlgmr.msra.gmra.mrb[0].mxu0 %vm420_vm0, %v464_v33 }
 0x15c   : > { %2087 = vmatprep.mubr.msk.bf16.mxu0 %vm2463_vm1, %v2462_v15 }
 0x22e   : > { %v518_v34 = vpop.f32.mrb[0].mxu0 }
 0x22f   : > { %v2083_v35 = vpop.f32.mrb[1].mxu0 }
 0x230   : > { %v521_v36 = vpop.f32.mrb[2].mxu0 }
 0x231   : > { %v525_v37 = vpack.c.bf16 %v521_v36, %v518_v34  ;;  %v2084_v38 = vpop.f32.mrb[3].mxu0 }
 0x233   : > { %529 = vrot.lane.b32.xlu1 %v525_v37, %s2464_s20  ;;  %527 = vrot.lane.b32.xlu0 %v525_v37, %s2465_s26  ;;  %s2472_s20 = smov 64   ;;  %s2473_s26 = smov 4  }
 0x237   : > { %531 = vrot.lane.b32.xlu1 %v525_v37, %s2466_s28  ;;  %535 = vrot.lane.b32.xlu0 %v525_v37, %s2467_s29  ;;  %s3108_s28 = smov 8   ;;  %s2475_s29 = smov 12  }
 0x23b   : > { %533 = vrot.lane.b32.xlu1 %v525_v37, %s2468_s15  ;;  %539 = vrot.lane.b32.xlu0 %v525_v37, %s2469_s16  ;;  %s2479_s15 = smov 28  }
 0x23f   : > { %537 = vrot.lane.b32.xlu1 %v525_v37, %s2470_s17  ;;  %s2476_s17 = smov 16  }
 0x243   : > { %548 = vrot.lane.b32.xlu1 %v525_v37, %s2471_s18 }
 0x2a5   : > { %v2630_v39 = vpop.permute.xlu1 %529  ;;  %v2632_v40 = vpop.permute.xlu0 %527 }
 0x2a6   : > { %647 = vrot.lane.b32.xlu1 %v2630_v39, %s2471_s18  ;;  %598 = vrot.lane.b32.xlu0 %v2632_v40, %s2471_s18 }
 0x2a9   : > { %v2636_v41 = vpop.permute.xlu1 %531  ;;  %v2639_v42 = vpop.permute.xlu0 %535 }
 0x2aa   : > { %696 = vrot.lane.b32.xlu0 %v2636_v41, %s2471_s18 }
 0x2ad   : > { %v2641_v43 = vpop.permute.xlu1 %533  ;;  %v2645_v44 = vpop.permute.xlu0 %539 }
 0x2ae   : > { %745 = vrot.lane.b32.xlu1 %v2641_v43, %s2471_s18  ;;  %794 = vrot.lane.b32.xlu0 %v2639_v42, %s2471_s18 }
 0x2b1   : > { %v2647_v45 = vpop.permute.xlu1 %537 }
 0x2b2   : > { %843 = vrot.lane.b32.xlu1 %v2647_v45, %s2471_s18  ;;  %892 = vrot.lane.b32.xlu0 %v2645_v44, %s2471_s18 }
 0x2b5   : > { %v549_v46 = vpop.permute.xlu1 %548 }
 0x2b6   : > { %v555_v47 = vsel %vm550_vm2, %v549_v46, 0  ;;  %1146 = vrot.lane.b32.xlu1 %v525_v37, %s2472_s20 }
 0x2b7   : > { %2086 = vmatpush3.bf16.xpose.msra.mxu0 %v555_v47 }
 0x2b8   : > { %2091 = vmatprep.subr.bf16.mxu0 %v2462_v15 }
 0x2be   : > { %2088 = vmatmul.mubr.msk.bf16.vlgmr.msra.gmra.mrb[4].mxu0 %vm550_vm2, %v525_v37 }
 0x2bf   : > { %2093 = vmatprep.mubr.msk.bf16.mxu0 %vm2463_vm1, %v2462_v15 }
 0x318   : > { %v648_v48 = vpop.permute.xlu1 %647  ;;  %v599_v49 = vpop.permute.xlu0 %598 }
 0x319   : > { %v604_v50 = vsel %vm550_vm2, %v599_v49, 0  ;;  %v653_v51 = vsel %vm550_vm2, %v648_v48, 0 }
 0x31a   : > { %2092 = vmatpush3.bf16.xpose.msra.mxu0 %v604_v50  ;;  %2098 = vmatpush3.bf16.xpose.msra.mxu1 %v653_v51 }
 0x31b   : > { %2103 = vmatprep.subr.bf16.mxu0 %v2462_v15  ;;  %2109 = vmatprep.subr.bf16.mxu1 %v2462_v15 }
 0x31c   : > { %v697_v52 = vpop.permute.xlu0 %696 }
 0x31d   : > { %v702_v54 = vsel %vm550_vm2, %v697_v52, 0 }
 0x320   : > { %v746_v53 = vpop.permute.xlu1 %745  ;;  %v795_v56 = vpop.permute.xlu0 %794 }
 0x321   : > { %v751_v55 = vsel %vm550_vm2, %v746_v53, 0  ;;  %2094 = vmatmul.mubr.msk.bf16.vlgmr.msra.gmra.mrb[8].mxu0 %vm550_vm2, %v2632_v40  ;;  %2100 = vmatmul.mubr.msk.bf16.vlgmr.msra.gmra.mrb[0].mxu1 %vm550_vm2, %v2630_v39  ;;  %v800_v58 = vsel %vm550_vm2, %v795_v56, 0 }
 0x322   : > { %2104 = vmatpush3.bf16.xpose.msra.mxu0 %v702_v54  ;;  %2110 = vmatpush3.bf16.xpose.msra.mxu1 %v751_v55 }
 0x323   : > { %2111 = vmatprep.mubr.msk.bf16.mxu1 %vm2463_vm1, %v2462_v15  ;;  %2105 = vmatprep.mubr.msk.bf16.mxu0 %vm2463_vm1, %v2462_v15 }
 0x324   : > { %2115 = vmatprep.subr.bf16.mxu0 %v2462_v15  ;;  %2121 = vmatprep.subr.bf16.mxu1 %v2462_v15  ;;  %v844_v57 = vpop.permute.xlu1 %843  ;;  %v893_v60 = vpop.permute.xlu0 %892 }
 0x325   : > { %v849_v59 = vsel %vm550_vm2, %v844_v57, 0  ;;  %v898_v61 = vsel %vm550_vm2, %v893_v60, 0 }
 0x328   : > { %v1147_v62 = vpop.permute.xlu1 %1146 }
 0x329   : > { %2106 = vmatmul.mubr.msk.bf16.vlgmr.msra.gmra.mrb[12].mxu0 %vm550_vm2, %v2636_v41  ;;  %2112 = vmatmul.mubr.msk.bf16.vlgmr.msra.gmra.mrb[4].mxu1 %vm550_vm2, %v2641_v43 }
 0x32a   : > { %2116 = vmatpush3.bf16.xpose.msra.mxu0 %v800_v58  ;;  %2122 = vmatpush3.bf16.xpose.msra.mxu1 %v849_v59 }
 0x32b   : > { %2117 = vmatprep.mubr.msk.bf16.mxu0 %vm2463_vm1, %v2462_v15  ;;  %2123 = vmatprep.mubr.msk.bf16.mxu1 %vm2463_vm1, %v2462_v15 }
 0x32c   : > { %2127 = vmatprep.subr.bf16.mxu0 %v2462_v15  ;;  %2133 = vmatprep.subr.bf16.mxu1 %v2462_v15 }
 0x331   : > { %2118 = vmatmul.mubr.msk.bf16.vlgmr.msra.gmra.mrb[16].mxu0 %vm550_vm2, %v2639_v42  ;;  %2124 = vmatmul.mubr.msk.bf16.vlgmr.msra.gmra.mrb[8].mxu1 %vm550_vm2, %v2647_v45 }
 0x332   : > { %2128 = vmatpush3.bf16.xpose.msra.mxu0 %v898_v61  ;;  %2134 = vmatpush3.bf16.msra.mxu1 %v1147_v62 }
 0x333   : > { %2129 = vmatprep.mubr.msk.bf16.mxu0 %vm2463_vm1, %v2462_v15  ;;  %2139 = vmatprep.subr.bf16.mxu0 %v2462_v15 }
 0x334   : > { %2135 = vmatprep.mubr.msk.bf16.mxu1 %vm2463_vm1, %v2462_v15  ;;  %2145 = vmatprep.subr.bf16.mxu1 %v2462_v15 }
 0x339   : > { %2130 = vmatmul.mubr.msk.bf16.vlgmr.msra.gmra.mrb[20].mxu0 %vm550_vm2, %v2645_v44 }
 0x33a   : > { %2141 = vmatprep.mubr.msk.bf16.mxu0 %vm2463_vm1, %v2462_v15 }
 0x391   : > { %v591_v4 = vpop.f32.mrb[4].mxu0 }
 0x392   : > { %v2710_v6 = vsel %vm2700_vm3, %v591_v4, -inf  ;;  %v2089_v7 = vpop.f32.mrb[5].mxu0 }
 0x393   : > { %v594_v8 = vpop.f32.mrb[6].mxu0  ;;  %v962_v9 = vsel %vm961_vm4, %v2710_v6, -inf }
 0x394   : > { %v2716_v10 = vsel %vm2704_vm5, %v594_v8, -inf  ;;  %963 = vmax.xlane.f32.xlu1 %v962_v9  ;;  %v2090_v11 = vpop.f32.mrb[7].mxu0 }
 0x395   : > { %v965_v12 = vsel %vm961_vm4, %v2716_v10, -inf }
 0x396   : > { %966 = vmax.xlane.f32.xlu0 %v965_v12 }
 0x3f4   : > { %v640_v13 = vpop.f32.mrb[8].mxu0  ;;  %v689_v14 = vpop.f32.mrb[0].mxu1 }
 0x3f5   : > { %v2722_v16 = vsel %vm2700_vm3, %v640_v13, -inf  ;;  %v2726_v17 = vsel %vm2700_vm3, %v689_v14, -inf  ;;  %v2095_v18 = vpop.f32.mrb[9].mxu0  ;;  %v2101_v19 = vpop.f32.mrb[1].mxu1 }
 0x3f6   : > { %v643_v20 = vpop.f32.mrb[10].mxu0  ;;  %v692_v21 = vpop.f32.mrb[2].mxu1  ;;  %v974_v22 = vsel %vm961_vm4, %v2726_v17, -inf  ;;  %v968_v23 = vsel %vm961_vm4, %v2722_v16, -inf }
 0x3f7   : > { %v2734_v24 = vsel %vm2704_vm5, %v643_v20, -inf  ;;  %v2102_v25 = vpop.f32.mrb[3].mxu1  ;;  %975 = vmax.xlane.f32.xlu1 %v974_v22  ;;  %969 = vmax.xlane.f32.xlu0 %v968_v23  ;;  %v2096_v26 = vpop.f32.mrb[11].mxu0  ;;  %v2740_v28 = vsel %vm2704_vm5, %v692_v21, -inf }
 0x3f8   : > { %v971_v27 = vsel %vm961_vm4, %v2734_v24, -inf  ;;  %v977_v36 = vsel %vm961_vm4, %v2740_v28, -inf }
 0x3fb   : > { %972 = vmax.xlane.f32.xlu0 %v971_v27 }
 0x3fc   : > { %v738_v29 = vpop.f32.mrb[12].mxu0  ;;  %v787_v30 = vpop.f32.mrb[4].mxu1 }
 0x3fd   : > { %v2744_v31 = vsel %vm2700_vm3, %v738_v29, -inf  ;;  %v2107_v32 = vpop.f32.mrb[13].mxu0  ;;  %v2113_v33 = vpop.f32.mrb[5].mxu1  ;;  %v2752_v38 = vsel %vm2700_vm3, %v787_v30, -inf }
 0x3fe   : > { %v741_v34 = vpop.f32.mrb[14].mxu0  ;;  %v790_v35 = vpop.f32.mrb[6].mxu1  ;;  %v980_v37 = vsel %vm961_vm4, %v2744_v31, -inf  ;;  %v986_v49 = vsel %vm961_vm4, %v2752_v38, -inf }
 0x3ff   : > { %v2756_v46 = vsel %vm2704_vm5, %v741_v34, -inf  ;;  %v2114_v47 = vpop.f32.mrb[7].mxu1  ;;  %978 = vmax.xlane.f32.xlu0 %v977_v36  ;;  %981 = vmax.xlane.f32.xlu1 %v980_v37  ;;  %v2108_v48 = vpop.f32.mrb[15].mxu0  ;;  %v2764_v51 = vsel %vm2704_vm5, %v790_v35, -inf }
 0x400   : > { %v983_v50 = vsel %vm961_vm4, %v2756_v46, -inf  ;;  %v989_v59 = vsel %vm961_vm4, %v2764_v51, -inf }
 0x403   : > { %987 = vmax.xlane.f32.xlu1 %v986_v49  ;;  %984 = vmax.xlane.f32.xlu0 %v983_v50 }
 0x404   : > { %v836_v52 = vpop.f32.mrb[16].mxu0  ;;  %v885_v53 = vpop.f32.mrb[8].mxu1 }
 0x405   : > { %v2768_v54 = vsel %vm2700_vm3, %v836_v52, -inf  ;;  %v2119_v55 = vpop.f32.mrb[17].mxu0  ;;  %v2125_v56 = vpop.f32.mrb[9].mxu1  ;;  %v2776_v61 = vsel %vm2700_vm3, %v885_v53, -inf }
 0x406   : > { %v839_v57 = vpop.f32.mrb[18].mxu0  ;;  %v888_v58 = vpop.f32.mrb[10].mxu1  ;;  %v992_v60 = vsel %vm961_vm4, %v2768_v54, -inf  ;;  %v998_v1 = vsel %vm961_vm4, %v2776_v61, -inf }
 0x407   : > { %v2780_v62 = vsel %vm2704_vm5, %v839_v57, -inf  ;;  %v2126_v63 = vpop.f32.mrb[11].mxu1  ;;  %990 = vmax.xlane.f32.xlu0 %v989_v59  ;;  %993 = vmax.xlane.f32.xlu1 %v992_v60  ;;  %v2120_v0 = vpop.f32.mrb[19].mxu0  ;;  %v2788_v4 = vsel %vm2704_vm5, %v888_v58, -inf }
 0x408   : > { %v995_v2 = vsel %vm961_vm4, %v2780_v62, -inf  ;;  %v1001_v12 = vsel %vm961_vm4, %v2788_v4, -inf }
 0x40b   : > { %999 = vmax.xlane.f32.xlu1 %v998_v1  ;;  %996 = vmax.xlane.f32.xlu0 %v995_v2 }
 0x40c   : > { %v934_v7 = vpop.f32.mrb[20].mxu0 }
 0x40d   : > { %v2792_v8 = vsel %vm2700_vm3, %v934_v7, -inf  ;;  %v2131_v9 = vpop.f32.mrb[21].mxu0 }
 0x40e   : > { %v937_v11 = vpop.f32.mrb[22].mxu0  ;;  %v1004_v13 = vsel %vm961_vm4, %v2792_v8, -inf }
 0x40f   : > { %v2800_v14 = vsel %vm2704_vm5, %v937_v11, -inf  ;;  %1002 = vmax.xlane.f32.xlu0 %v1001_v12  ;;  %1005 = vmax.xlane.f32.xlu1 %v1004_v13  ;;  %v2132_v18 = vpop.f32.mrb[23].mxu0 }
 0x410   : > { %v1007_v3 = vsel %vm961_vm4, %v2800_v14, -inf }
 0x413   : > { %1008 = vmax.xlane.f32.xlu0 %v1007_v3 }
 0x420   : > { %1240 = vrot.lane.b32.xlu1 %v2630_v39, %s2472_s20 }
 0x421   : > { %v964_v5 = vpop.xlane.xlu1 %963 }
 0x422   : > { %v1010_v20 = vsub.f32 %v2710_v6, %v964_v5 }
 0x423   : > { %v967_v19 = vpop.xlane.xlu0 %966 }
 0x424   : > { %1287 = vrot.lane.b32.xlu1 %v2636_v41, %s2472_s20  ;;  %v1011_v21 = vsub.f32 %v2716_v10, %v967_v19  ;;  %v1026_v22 = vmul.f32 1.442695, %v1010_v20 }
 0x426   : > { %v1028_v39 = vmul.f32 1.442695, %v1011_v21  ;;  %2328 = vpow2.f32 %v1026_v22 }
 0x428   : > { %1334 = vrot.lane.b32.xlu1 %v2641_v43, %s2472_s20  ;;  %2330 = vpow2.f32 %v1028_v39 }
 0x429   : > { %1193 = vrot.lane.b32.xlu0 %v2632_v40, %s2472_s20 }
 0x42d   : > { %1381 = vrot.lane.b32.xlu0 %v2639_v42, %s2472_s20 }
 0x430   : > { %v2816_v41 = vpop.eup %2328 }
 0x431   : > { %v1058_v40 = vsel %vm961_vm4, %v2816_v41, 0.0 }
 0x432   : > { %v2818_v23 = vpop.eup %2330 }
 0x433   : > { %v1061_v42 = vsel %vm961_vm4, %v2818_v23, 0.0 }
 0x44c   : > { %1059 = vadd.xlane.f32.xlu1 %v1058_v40  ;;  %1062 = vadd.xlane.f32.xlu0 %v1061_v42 }
 0x484   : > { %v976_v43 = vpop.xlane.xlu1 %975  ;;  %v970_v6 = vpop.xlane.xlu0 %969 }
 0x485   : > { %v1014_v10 = vsub.f32 %v2726_v17, %v976_v43  ;;  %v1012_v25 = vsub.f32 %v2722_v16, %v970_v6 }
 0x487   : > { %v1030_v26 = vmul.f32 1.442695, %v1012_v25  ;;  %v1034_v27 = vmul.f32 1.442695, %v1014_v10 }
 0x488   : > { %v973_v29 = vpop.xlane.xlu0 %972 }
 0x489   : > { %v1013_v30 = vsub.f32 %v2734_v24, %v973_v29  ;;  %2332 = vpow2.f32 %v1030_v26 }
 0x48a   : > { %2334 = vpow2.f32 %v1034_v27 }
 0x48b   : > { %v1032_v32 = vmul.f32 1.442695, %v1013_v30 }
 0x48c   : > { %v979_v33 = vpop.xlane.xlu0 %978  ;;  %v982_v34 = vpop.xlane.xlu1 %981 }
 0x48d   : > { %2336 = vpow2.f32 %v1032_v32  ;;  %v1015_v35 = vsub.f32 %v2740_v28, %v979_v33  ;;  %v1016_v36 = vsub.f32 %v2744_v31, %v982_v34 }
 0x48f   : > { %v1036_v37 = vmul.f32 1.442695, %v1015_v35  ;;  %v1038_v47 = vmul.f32 1.442695, %v1016_v36 }
 0x490   : > { %v988_v17 = vpop.xlane.xlu1 %987  ;;  %v985_v48 = vpop.xlane.xlu0 %984 }
 0x491   : > { %2338 = vpow2.f32 %v1036_v37  ;;  %v1018_v16 = vsub.f32 %v2752_v38, %v988_v17  ;;  %v1017_v49 = vsub.f32 %v2756_v46, %v985_v48 }
 0x492   : > { %2340 = vpow2.f32 %v1038_v47 }
 0x493   : > { %v1042_v24 = vmul.f32 1.442695, %v1018_v16  ;;  %v1040_v50 = vmul.f32 1.442695, %v1017_v49  ;;  %v2831_v52 = vpop.eup %2332 }
 0x494   : > { %v991_v53 = vpop.xlane.xlu0 %990  ;;  %v994_v55 = vpop.xlane.xlu1 %993  ;;  %v1064_v56 = vsel %vm961_vm4, %v2831_v52, 0.0 }
 0x495   : > { %2342 = vpow2.f32 %v1042_v24  ;;  %v1019_v28 = vsub.f32 %v2764_v51, %v991_v53  ;;  %v1020_v31 = vsub.f32 %v2768_v54, %v994_v55  ;;  %v2837_v57 = vpop.eup %2334  ;;  %1065 = vadd.xlane.f32.xlu1 %v1064_v56 }
 0x496   : > { %2344 = vpow2.f32 %v1040_v50  ;;  %v1070_v0 = vsel %vm961_vm4, %v2837_v57, 0.0 }
 0x497   : > { %v2839_v38 = vpop.eup %2336  ;;  %v1044_v46 = vmul.f32 1.442695, %v1019_v28  ;;  %v1046_v58 = vmul.f32 1.442695, %v1020_v31 }
 0x498   : > { %v1000_v59 = vpop.xlane.xlu1 %999  ;;  %v997_v60 = vpop.xlane.xlu0 %996  ;;  %v1067_v63 = vsel %vm961_vm4, %v2839_v38, 0.0 }
 0x499   : > { %2346 = vpow2.f32 %v1044_v46  ;;  %v1022_v51 = vsub.f32 %v2776_v61, %v1000_v59  ;;  %v1021_v54 = vsub.f32 %v2780_v62, %v997_v60  ;;  %1068 = vadd.xlane.f32.xlu0 %v1067_v63  ;;  %1071 = vadd.xlane.f32.xlu1 %v1070_v0 }
 0x49a   : > { %2348 = vpow2.f32 %v1046_v58 }
 0x49b   : > { %v2847_v1 = vpop.eup %2338  ;;  %v1050_v2 = vmul.f32 1.442695, %v1022_v51  ;;  %v1048_v7 = vmul.f32 1.442695, %v1021_v54 }
 0x49c   : > { %v2849_v9 = vpop.eup %2340  ;;  %v1003_v11 = vpop.xlane.xlu0 %1002  ;;  %v1073_v13 = vsel %vm961_vm4, %v2847_v1, 0.0 }
 0x49d   : > { %v1006_v12 = vpop.xlane.xlu1 %1005  ;;  %2350 = vpow2.f32 %v1050_v2  ;;  %v1023_v61 = vsub.f32 %v2788_v4, %v1003_v11  ;;  %v1076_v18 = vsel %vm961_vm4, %v2849_v9, 0.0  ;;  %1074 = vadd.xlane.f32.xlu0 %v1073_v13 }
 0x49e   : > { %v1024_v62 = vsub.f32 %v2792_v8, %v1006_v12  ;;  %2352 = vpow2.f32 %v1048_v7  ;;  %1077 = vadd.xlane.f32.xlu1 %v1076_v18 }
 0x49f   : > { %v2857_v3 = vpop.eup %2342  ;;  %v1052_v5 = vmul.f32 1.442695, %v1023_v61 }
 0x4a0   : > { %v1054_v19 = vmul.f32 1.442695, %v1024_v62  ;;  %v2859_v20 = vpop.eup %2344  ;;  %v1009_v21 = vpop.xlane.xlu0 %1008  ;;  %v1082_v22 = vsel %vm961_vm4, %v2857_v3, 0.0 }
 0x4a1   : > { %2354 = vpow2.f32 %v1052_v5  ;;  %v1025_v4 = vsub.f32 %v2800_v14, %v1009_v21  ;;  %v1079_v8 = vsel %vm961_vm4, %v2859_v20, 0.0  ;;  %v1241_v36 = vpop.permute.xlu1 %1240 }
 0x4a2   : > { %2356 = vpow2.f32 %v1054_v19  ;;  %1083 = vadd.xlane.f32.xlu1 %v1082_v22  ;;  %1080 = vadd.xlane.f32.xlu0 %v1079_v8 }
 0x4a3   : > { %v2866_v39 = vpop.eup %2346  ;;  %v1056_v40 = vmul.f32 1.442695, %v1025_v4 }
 0x4a4   : > { %v2868_v42 = vpop.eup %2348  ;;  %v1194_v43 = vpop.permute.xlu0 %1193  ;;  %v1085_v6 = vsel %vm961_vm4, %v2866_v39, 0.0 }
 0x4a5   : > { %2358 = vpow2.f32 %v1056_v40  ;;  %v1088_v10 = vsel %vm961_vm4, %v2868_v42, 0.0  ;;  %2140 = vmatpush3.bf16.msra.mxu0 %v1194_v43  ;;  %v1288_v37 = vpop.permute.xlu1 %1287 }
 0x4a6   : > { %1089 = vadd.xlane.f32.xlu1 %v1088_v10  ;;  %1086 = vadd.xlane.f32.xlu0 %v1085_v6 }
 0x4a7   : > { %v2874_v14 = vpop.eup %2350  ;;  %2151 = vmatprep.subr.bf16.mxu0 %v2462_v15 }
 0x4a8   : > { %v2877_v25 = vpop.eup %2352  ;;  %v1094_v26 = vsel %vm961_vm4, %v2874_v14, 0.0  ;;  %v2899_v17 = vpop.permute.xlu0 %1381 }
 0x4a9   : > { %v1091_v27 = vsel %vm961_vm4, %v2877_v25, 0.0  ;;  %v1335_v47 = vpop.permute.xlu1 %1334 }
 0x4aa   : > { %1095 = vadd.xlane.f32.xlu1 %v1094_v26  ;;  %1092 = vadd.xlane.f32.xlu0 %v1091_v27 }
 0x4ab   : > { %v2883_v29 = vpop.eup %2354 }
 0x4ac   : > { %v2885_v30 = vpop.eup %2356  ;;  %v1097_v32 = vsel %vm961_vm4, %v2883_v29, 0.0 }
 0x4ad   : > { %v1100_v33 = vsel %vm961_vm4, %v2885_v30, 0.0 }
 0x4ae   : > { %1101 = vadd.xlane.f32.xlu1 %v1100_v33  ;;  %1098 = vadd.xlane.f32.xlu0 %v1097_v32 }
 0x4af   : > { %v2891_v34 = vpop.eup %2358 }
 0x4b0   : > { %v1103_v35 = vsel %vm961_vm4, %v2891_v34, 0.0 }
 0x4b2   : > { %1104 = vadd.xlane.f32.xlu0 %v1103_v35 }
 0x4bf   : > { %1428 = vrot.lane.b32.xlu1 %v2647_v45, %s2472_s20 }
 0x4c8   : > { %1475 = vrot.lane.b32.xlu0 %v2645_v44, %s2472_s20  ;;  %s405_s20 = sand.u32 1, %s2452_s22  }
 0x4d9   : > { %v1060_v48 = vpop.xlane.xlu1 %1059  ;;  %v1063_v16 = vpop.xlane.xlu0 %1062 }
 0x4da   : > { %2360 = vrcp.f32 %v1060_v48 }
 0x4db   : > { %2362 = vrcp.f32 %v1063_v16 }
 0x4e4   : > { %v2361_v49 = vpop.eup %2360 }
 0x4e5   : > { %v2363_v24 = vpop.eup %2362  ;;  %v1122_v50 = vmul.f32 %v2361_v49, %v2816_v41 }
 0x4e6   : > { %v1123_v53 = vmul.f32 %v2363_v24, %v2818_v23 }
 0x4e8   : > { %v1138_v55 = vpack.c.bf16 %v1123_v53, %v1122_v50 }
 0x4ea   : > { %2136 = vmatmul.mubr.msk.bf16.vlgmr.msra.gmra.mrb[12].mxu1 %vm961_vm4, %v1138_v55 }
 0x4eb   : > { %2146 = vmatpush3.bf16.msra.mxu1 %v1241_v36  ;;  %2147 = vmatprep.mubr.msk.bf16.mxu1 %vm2463_vm1, %v2462_v15 }
 0x4ec   : > { %2157 = vmatprep.subr.bf16.mxu1 %v2462_v15 }
 0x522   : > { %v1066_v44 = vpop.xlane.xlu1 %1065 }
 0x523   : > { %2364 = vrcp.f32 %v1066_v44 }
 0x526   : > { %v1069_v45 = vpop.xlane.xlu0 %1068  ;;  %v1072_v28 = vpop.xlane.xlu1 %1071 }
 0x527   : > { %2366 = vrcp.f32 %v1069_v45 }
 0x528   : > { %2368 = vrcp.f32 %v1072_v28 }
 0x52a   : > { %v1075_v31 = vpop.xlane.xlu0 %1074 }
 0x52b   : > { %v1078_v56 = vpop.xlane.xlu1 %1077  ;;  %2370 = vrcp.f32 %v1075_v31 }
 0x52c   : > { %2372 = vrcp.f32 %v1078_v56 }
 0x52d   : > { %v2365_v41 = vpop.eup %2364 }
 0x52e   : > { %v1124_v59 = vmul.f32 %v2365_v41, %v2831_v52 }
 0x52f   : > { %v1084_v23 = vpop.xlane.xlu1 %1083  ;;  %v1081_v46 = vpop.xlane.xlu0 %1080 }
 0x530   : > { %2374 = vrcp.f32 %v1081_v46 }
 0x531   : > { %v2367_v58 = vpop.eup %2366  ;;  %2376 = vrcp.f32 %v1084_v23 }
 0x532   : > { %v1125_v60 = vmul.f32 %v2367_v58, %v2839_v38  ;;  %v2369_v63 = vpop.eup %2368 }
 0x533   : > { %v1090_v51 = vpop.xlane.xlu1 %1089  ;;  %v1087_v54 = vpop.xlane.xlu0 %1086  ;;  %v1126_v7 = vmul.f32 %v2369_v63, %v2837_v57 }
 0x534   : > { %v1139_v0 = vpack.c.bf16 %v1125_v60, %v1124_v59  ;;  %2378 = vrcp.f32 %v1087_v54  ;;  %v2312_v59 = vld [vmem:[%s3099_s4] sm:$0xff]  }
 0x535   : > { %v2371_v2 = vpop.eup %2370  ;;  %2380 = vrcp.f32 %v1090_v51 }
 0x536   : > { %v1127_v11 = vmul.f32 %v2371_v2, %v2847_v1  ;;  %2142 = vmatmul.mubr.msk.bf16.vlgmr.msra.gmra.mrb[24].mxu0 %vm961_vm4, %v1139_v0  ;;  %v2373_v38 = vpop.eup %2372  ;;  %v2313_v2 = vld [vmem:[%s3099_s4 + $0x8] sm:$0xff]  }
 0x537   : > { %v1096_v12 = vpop.xlane.xlu1 %1095  ;;  %2152 = vmatpush3.bf16.msra.mxu0 %v1288_v37  ;;  %v1093_v13 = vpop.xlane.xlu0 %1092  ;;  %2153 = vmatprep.mubr.msk.bf16.mxu0 %vm2463_vm1, %v2462_v15  ;;  %v1128_v62 = vmul.f32 %v2373_v38, %v2849_v9 }
 0x538   : > { %v1140_v52 = vpack.c.bf16 %v1127_v11, %v1126_v7  ;;  %2163 = vmatprep.subr.bf16.mxu0 %v2462_v15  ;;  %2382 = vrcp.f32 %v1093_v13 }
 0x539   : > { %2384 = vrcp.f32 %v1096_v12 }
 0x53a   : > { %2148 = vmatmul.mubr.msk.bf16.vlgmr.msra.gmra.mrb[16].mxu1 %vm961_vm4, %v1140_v52  ;;  %v2375_v61 = vpop.eup %2374 }
 0x53b   : > { %v1102_v57 = vpop.xlane.xlu1 %1101  ;;  %2158 = vmatpush3.bf16.msra.mxu1 %v1335_v47  ;;  %v1099_v1 = vpop.xlane.xlu0 %1098  ;;  %2159 = vmatprep.mubr.msk.bf16.mxu1 %vm2463_vm1, %v2462_v15  ;;  %v1129_v18 = vmul.f32 %v2375_v61, %v2859_v20 }
 0x53c   : > { %2169 = vmatprep.subr.bf16.mxu1 %v2462_v15  ;;  %v2377_v5 = vpop.eup %2376  ;;  %2386 = vrcp.f32 %v1099_v1 }
 0x53d   : > { %2388 = vrcp.f32 %v1102_v57  ;;  %v1141_v19 = vpack.c.bf16 %v1129_v18, %v1128_v62  ;;  %v1130_v4 = vmul.f32 %v2377_v5, %v2857_v3 }
 0x53e   : > { %v2379_v21 = vpop.eup %2378 }
 0x53f   : > { %v1105_v22 = vpop.xlane.xlu0 %1104  ;;  %v1131_v8 = vmul.f32 %v2379_v21, %v2866_v39  ;;  %2154 = vmatmul.mubr.msk.bf16.vlgmr.msra.gmra.mrb[28].mxu0 %vm961_vm4, %v1141_v19  ;;  %v2381_v40 = vpop.eup %2380 }
 0x540   : > { %2390 = vrcp.f32 %v1105_v22  ;;  %2164 = vmatpush3.bf16.msra.mxu0 %v2899_v17  ;;  %2165 = vmatprep.mubr.msk.bf16.mxu0 %vm2463_vm1, %v2462_v15  ;;  %v1132_v43 = vmul.f32 %v2381_v40, %v2868_v42  ;;  %v1429_v3 = vpop.permute.xlu1 %1428 }
 0x541   : > { %v1142_v9 = vpack.c.bf16 %v1131_v8, %v1130_v4  ;;  %2175 = vmatprep.subr.bf16.mxu0 %v2462_v15 }
 0x542   : > { %v2383_v20 = vpop.eup %2382 }
 0x543   : > { %v1133_v6 = vmul.f32 %v2383_v20, %v2877_v25  ;;  %2160 = vmatmul.mubr.msk.bf16.vlgmr.msra.gmra.mrb[20].mxu1 %vm961_vm4, %v1142_v9  ;;  %v2385_v39 = vpop.eup %2384  ;;  %v1476_v42 = vpop.permute.xlu0 %1475 }
 0x544   : > { %2170 = vmatpush3.bf16.msra.mxu1 %v1429_v3  ;;  %2171 = vmatprep.mubr.msk.bf16.mxu1 %vm2463_vm1, %v2462_v15  ;;  %v1134_v32 = vmul.f32 %v2385_v39, %v2874_v14 }
 0x545   : > { %v1143_v10 = vpack.c.bf16 %v1133_v6, %v1132_v43  ;;  %2181 = vmatprep.subr.bf16.mxu1 %v2462_v15 }
 0x546   : > { %v2387_v26 = vpop.eup %2386 }
 0x547   : > { %v2389_v27 = vpop.eup %2388  ;;  %v1135_v33 = vmul.f32 %v2387_v26, %v2883_v29  ;;  %2166 = vmatmul.mubr.msk.bf16.vlgmr.msra.gmra.mrb[32].mxu0 %vm961_vm4, %v1143_v10 }
 0x548   : > { %2176 = vmatpush3.bf16.msra.mxu0 %v1476_v42  ;;  %2177 = vmatprep.mubr.msk.bf16.mxu0 %vm2463_vm1, %v2462_v15  ;;  %v1136_v36 = vmul.f32 %v2389_v27, %v2885_v30 }
 0x549   : > { %v1144_v35 = vpack.c.bf16 %v1135_v33, %v1134_v32  ;;  %2189 = vmatprep.subr.bf16.mxu0 %v2462_v15 }
 0x54a   : > { %v2391_v25 = vpop.eup %2390 }
 0x54b   : > { %v1137_v37 = vmul.f32 %v2391_v25, %v2891_v34  ;;  %2172 = vmatmul.mubr.msk.bf16.vlgmr.msra.gmra.mrb[24].mxu1 %vm961_vm4, %v1144_v35 }
 0x54c   : > { %2185 = vmatprep.mubr.msk.bf16.mxu1 %vm2463_vm1, %v2462_v15  ;;  %2182 = vmatpush3.bf16.msra.mxu1 %v2312_v59 }
 0x54d   : > { %v1145_v14 = vpack.c.bf16 %v1137_v37, %v1136_v36  ;;  %2183 = vmatprep.subr.bf16.mxu1 %v2462_v15 }
 0x54f   : > { %2178 = vmatmul.mubr.msk.bf16.vlgmr.msra.gmra.mrb[36].mxu0 %vm961_vm4, %v1145_v14 }
 0x550   : > { %2193 = vmatprep.mubr.msk.bf16.mxu0 %vm2463_vm1, %v2462_v15  ;;  %2184 = vmatpush3.bf16.msra.mxu1 %v2313_v2 }
 0x551   : > { %2197 = vmatprep.subr.bf16.mxu1 %v2462_v15 }
 0x5bd   : > { %v2948_v29 = vpop.f32.mrb[12].mxu1 }
 0x5be   : > { %v2137_v47 = vpop.f32.mrb[13].mxu1 }
 0x5bf   : > { %v2950_v17 = vpop.f32.mrb[14].mxu1 }
 0x5c0   : > { %v2138_v48 = vpop.f32.mrb[15].mxu1 }
 0x609   : > { %v1233_v30 = vpop.f32.mrb[24].mxu0 }
 0x60a   : > { %v2143_v16 = vpop.f32.mrb[25].mxu0 }
 0x60b   : > { %v1236_v34 = vpop.f32.mrb[26].mxu0 }
 0x60c   : > { %v2275_v49 = vpack.i.bf16 %v1236_v34, %v1233_v30  ;;  %v2144_v24 = vpop.f32.mrb[27].mxu0 }
 0x60d   : > { %v1280_v50 = vpop.f32.mrb[16].mxu1 }
 0x60e   : > { %v2149_v53 = vpop.f32.mrb[17].mxu1  ;;  %2276 = vrot.lane.b32.xlu1 %v2275_v49, %s2473_s26  ;;  %s2477_s26 = smov 20  }
 0x60f   : > { %v1283_v55 = vpop.f32.mrb[18].mxu1 }
 0x610   : > { %v2280_v44 = vpack.i.bf16 %v1283_v55, %v1280_v50  ;;  %v2150_v45 = vpop.f32.mrb[19].mxu1 }
 0x612   : > { %2281 = vrot.lane.b32.xlu0 %v2280_v44, %s3108_s28  ;;  %v1327_v28 = vpop.f32.mrb[28].mxu0  ;;  %s2480_s28 = smov [#allocation2]  }
 0x613   : > { %v2155_v31 = vpop.f32.mrb[29].mxu0  ;;  %s2402_s0 = sshll.u32 %s2480_s28, 4  ;;  %s2403_s0 = int_to_ptr.vmem [resolvable:$false] %s2402_s0 }
 0x614   : > { %v1330_v56 = vpop.f32.mrb[30].mxu0  ;;  %s2404_s1 = scalar_lea.vmem %s2403_s0, 512 }
 0x615   : > { %v2285_v41 = vpack.i.bf16 %v1330_v56, %v1327_v28  ;;  %v2156_v23 = vpop.f32.mrb[31].mxu0  ;;  %v2002_v28 = vld [vmem:[%s3100_s5] ss:$0 sm:$0xff] }
 0x616   : > { %v1374_v46 = vpop.f32.mrb[20].mxu1 }
 0x617   : > { %v2161_v58 = vpop.f32.mrb[21].mxu1  ;;  %2286 = vrot.lane.b32.xlu1 %v2285_v41, %s2475_s29  ;;  %s2478_s29 = smov 24  }
 0x618   : > { %v1377_v60 = vpop.f32.mrb[22].mxu1 }
 0x619   : > { %v2290_v63 = vpack.i.bf16 %v1377_v60, %v1374_v46  ;;  %v2162_v51 = vpop.f32.mrb[23].mxu1  ;;  %v2396_v46 = vld [vmem:[%s2599_s19] sm:$0xff] }
 0x61a   : > { %v1421_v54 = vpop.f32.mrb[32].mxu0 }
 0x61b   : > { %2291 = vrot.lane.b32.xlu0 %v2290_v63, %s2476_s17  ;;  %v2167_v0 = vpop.f32.mrb[33].mxu0  ;;  %v2397_v63 = vld [vmem:[%s2599_s19 + $0x8] sm:$0xff]  ;;  %s2026_s19 = sshll.u32 %s2568_s25, 8  ;;  %s3053_s25 = scalar_lea.sflag [#allocation3], %s405_s20 }
 0x61c   : > { %v1424_v7 = vpop.f32.mrb[34].mxu0 }
 0x61d   : > { %v2295_v11 = vpack.i.bf16 %v1424_v7, %v1421_v54  ;;  %v2168_v12 = vpop.f32.mrb[35].mxu0 }
 0x61e   : > { %v1468_v13 = vpop.f32.mrb[24].mxu1 }
 0x61f   : > { %v2173_v52 = vpop.f32.mrb[25].mxu1  ;;  %2296 = vrot.lane.b32.xlu1 %v2295_v11, %s2477_s26  ;;  %s1978_s26 = sshll.u32 %s405_s20, 4 }
 0x620   : > { %v1471_v38 = vpop.f32.mrb[26].mxu1  ;;  %s407_s16 = scalar_lea.vmem [#allocation2], %s1978_s26 }
 0x621   : > { %v2300_v61 = vpack.i.bf16 %v1471_v38, %v1468_v13  ;;  %v2174_v57 = vpop.f32.mrb[27].mxu1  ;;  %s1912_s17 = sshll.u32 %s407_s16, 4  ;;  %s3043_s17 = int_to_ptr.vmem [resolvable:$true] %s1912_s17 }
 0x622   : > { %v1515_v1 = vpop.f32.mrb[36].mxu0  ;;  %p2405_p0 = scmp.lt.s32.totalorder %s3043_s17, %s2403_s0 }
 0x623   : > { %2301 = vrot.lane.b32.xlu0 %v2300_v61, %s2478_s29  ;;  %v2179_v62 = vpop.f32.mrb[37].mxu0  ;;  %s3050_s29 = scalar_lea.hbm %s3107_s12, %s2026_s19 }
 0x624   : > { %v1518_v18 = vpop.f32.mrb[38].mxu0  ;;  %v2314_v62 = vld [vmem:[%s3103_s8] sm:$0xff]  }
 0x625   : > { %v2305_v5 = vpack.i.bf16 %v1518_v18, %v1515_v1  ;;  %v2180_v19 = vpop.f32.mrb[39].mxu0  ;;  %2190 = vmatpush3.bf16.msra.mxu0 %v2314_v62  ;;  %v2315_v18 = vld [vmem:[%s3103_s8 + $0x8] sm:$0xff]  }
 0x626   : > { %2191 = vmatprep.subr.bf16.mxu0 %v2462_v15  ;;  %v2317_v19 = vld [vmem:[%s3105_s10 + $0x8] sm:$0xff]  }
 0x627   : > { %2306 = vrot.lane.b32.xlu1 %v2305_v5, %s2479_s15  ;;  %v2316_v5 = vld [vmem:[%s3105_s10] sm:$0xff]   ;;  %s2398_s15 = scalar_lea.vmem %s3043_s17, 256 }
 0x628   : > { %p2399_p11 = scmp.ne.s32.totalorder %s3043_s17, %s2398_s15  ;;  %p2406_p1 = scmp.lt.s32.totalorder %s2404_s1, %s2398_s15 }
 0x629   : > { %2192 = vmatpush3.bf16.msra.mxu0 %v2315_v18 }
 0x62a   : > { %p2400_p12 = pnand %p2399_p11, %p2585_p5  ;;  %p2407_p2 = por %p2406_p1, %p2405_p0 }
 0x62c   : > { %p2401_p13 = pneg %p2400_p12 }
 0x62e   : > { %p2408_p3 = pnand %p2407_p2, %p2401_p13 }
 0x680   : > { %v2277_v21 = vpop.permute.xlu1 %2276 }
 0x681   : > { %v2279_v40 = vunpack.i.h.bf16 %v2277_v21  ;;  %v2278_v9 = vunpack.i.l.bf16 %v2277_v21  ;;  %v2318_v21 = vld [vmem:[%s3105_s10 + $0x10] sm:$0xff]  }
 0x683   : > { %v1579_v32 = vsel %vm550_vm2, %v2950_v17, %v2279_v40  ;;  %v1578_v33 = vsel %vm550_vm2, %v2948_v29, %v2278_v9 }
 0x684   : > { %v2282_v22 = vpop.permute.xlu0 %2281 }
 0x685   : > { %v2284_v20 = vunpack.i.h.bf16 %v2282_v22  ;;  %v2283_v43 = vunpack.i.l.bf16 %v2282_v22  ;;  %v2319_v22 = vld [vmem:[%s3105_s10 + $0x18] sm:$0xff]  }
 0x687   : > { %v1581_v35 = vsel %vm1580_vm6, %v1578_v33, %v2283_v43  ;;  %v1582_v36 = vsel %vm1580_vm6, %v1579_v32, %v2284_v20 }
 0x689   : > { %v2287_v4 = vpop.permute.xlu1 %2286 }
 0x68a   : > { %v2289_v3 = vunpack.i.h.bf16 %v2287_v4  ;;  %v2288_v39 = vunpack.i.l.bf16 %v2287_v4  ;;  %v2320_v4 = vld [vmem:[%s3105_s10 + $0x20] sm:$0xff]  }
 0x68c   : > { %v1585_v47 = vsel %vm1583_vm7, %v1582_v36, %v2289_v3  ;;  %v1584_v48 = vsel %vm1583_vm7, %v1581_v35, %v2288_v39 }
 0x68d   : > { %v2292_v8 = vpop.permute.xlu0 %2291 }
 0x68e   : > { %v2294_v10 = vunpack.i.h.bf16 %v2292_v8  ;;  %v2293_v26 = vunpack.i.l.bf16 %v2292_v8  ;;  %v2321_v8 = vld [vmem:[%s3105_s10 + $0x28] sm:$0xff]  }
 0x690   : > { %v1586_v30 = vsel %vm961_vm4, %v1584_v48, %v2293_v26  ;;  %v1587_v16 = vsel %vm961_vm4, %v1585_v47, %v2294_v10  ;;  %v2006_v26 = vld [vmem:[%s3101_s6] ss:$0 sm:$0xff]  ;;  %v2323_v47 = vld [vmem:[%s3105_s10 + $0x38] sm:$0xff]  }
 0x691   : > { %v2297_v6 = vpop.permute.xlu1 %2296  ;;  %v2008_v48 = vld [vmem:[%s3104_s9] ss:$0 sm:$0xff] }
 0x692   : > { %v2299_v42 = vunpack.i.h.bf16 %v2297_v6  ;;  %v2298_v25 = vunpack.i.l.bf16 %v2297_v6 }
 0x694   : > { %v1590_v17 = vsel %vm1588_vm8, %v1587_v16, %v2299_v42  ;;  %v1589_v29 = vsel %vm1588_vm8, %v1586_v30, %v2298_v25  ;;  %v2007_v42 = vld [vmem:[%s3102_s7] ss:$0 sm:$0xff] }
 0x695   : > { %v2302_v27 = vpop.permute.xlu0 %2301 }
 0x696   : > { %v2304_v37 = vunpack.i.h.bf16 %v2302_v27  ;;  %v2303_v14 = vunpack.i.l.bf16 %v2302_v27 }
 0x698   : > { %v1592_v50 = vsel %vm1591_vm9, %v1589_v29, %v2303_v14  ;;  %v1593_v53 = vsel %vm1591_vm9, %v1590_v17, %v2304_v37  ;;  %v2322_v14 = vld [vmem:[%s3105_s10 + $0x30] sm:$0xff]  }
 0x699   : > { %v2307_v34 = vpop.permute.xlu1 %2306 }
 0x69a   : > { %v2309_v49 = vunpack.i.h.bf16 %v2307_v34  ;;  %v2308_v24 = vunpack.i.l.bf16 %v2307_v34 }
 0x69c   : > { %v1596_v55 = vsel %vm1594_vm10, %v1593_v53, %v2309_v49  ;;  %v1595_v44 = vsel %vm1594_vm10, %v1592_v50, %v2308_v24 }
 0x69d   : > { %v1597_v45 = vpack.c.bf16 %v1596_v55, %v1595_v44 }
 0x69f   : > { %2186 = vmatmul.mubr.msk.bf16.vlgmr.msra.gmra.mrb[28].mxu1 %vm420_vm0, %v1597_v45 }
 0x6a0   : > { %2213 = vmatprep.mubr.msk.bf16.mxu1 %vm2463_vm1, %v2462_v15  ;;  %2198 = vmatpush3.bf16.msra.mxu1 %v2316_v5 }
 0x6a1   : > { %2199 = vmatprep.subr.bf16.mxu1 %v2462_v15 }
 0x6a4   : > { %2200 = vmatpush3.bf16.msra.mxu1 %v2317_v19 }
 0x6a5   : > { %2201 = vmatprep.subr.bf16.mxu1 %v2462_v15 }
 0x6a8   : > { %2202 = vmatpush3.bf16.msra.mxu1 %v2318_v21 }
 0x6a9   : > { %2203 = vmatprep.subr.bf16.mxu1 %v2462_v15 }
 0x6ac   : > { %2204 = vmatpush3.bf16.msra.mxu1 %v2319_v22 }
 0x6ad   : > { %2205 = vmatprep.subr.bf16.mxu1 %v2462_v15 }
 0x6b0   : > { %2206 = vmatpush3.bf16.msra.mxu1 %v2320_v4 }
 0x6b1   : > { %2207 = vmatprep.subr.bf16.mxu1 %v2462_v15 }
 0x6b4   : > { %2208 = vmatpush3.bf16.msra.mxu1 %v2321_v8 }
 0x6b5   : > { %2209 = vmatprep.subr.bf16.mxu1 %v2462_v15 }
 0x6b8   : > { %2210 = vmatpush3.bf16.msra.mxu1 %v2322_v14 }
 0x6b9   : > { %2211 = vmatprep.subr.bf16.mxu1 %v2462_v15  ;;  %v2012_v15 = vld [vmem:[%s3106_s11] ss:$0 sm:$0xff] }
 0x6bc   : > { %2212 = vmatpush3.bf16.msra.mxu1 %v2323_v47 }
 0x772   : > { %v1658_v31 = vpop.f32.mrb[28].mxu1 }
 0x773   : > { %v1659_v56 = vadd.f32 %v2002_v28, %v1658_v31  ;;  %v2187_v41 = vpop.f32.mrb[29].mxu1 }
 0x774   : > { %v1661_v23 = vpop.f32.mrb[30].mxu1 }
 0x775   : > { %v2976_v58 = vadd.f32 %v2396_v46, %v1659_v56  ;;  %v1662_v59 = vadd.f32 %v2002_v28, %v1661_v23  ;;  %v2188_v60 = vpop.f32.mrb[31].mxu1 }
 0x777   : > { %v2979_v51 = vadd.f32 %v2397_v63, %v1662_v59  ;;  %v1669_v54 = vsel %vm420_vm0, %v2976_v58, 0.0 }
 0x778   : > { %1670 = vadd.xlane.f32.xlu0 %v1669_v54 }
 0x779   : > { %v1672_v0 = vsel %vm420_vm0, %v2979_v51, 0.0 }
 0x77a   : > { %1673 = vadd.xlane.f32.xlu1 %v1672_v0 }
 0x805   : > { %v1671_v2 = vpop.xlane.xlu0 %1670 }
 0x806   : > { %v1675_v7 = vmul.f32 0.03125, %v1671_v2 }
 0x807   : > { %v1674_v11 = vpop.xlane.xlu1 %1673 }
 0x808   : > { %v1677_v12 = vsub.f32 %v2976_v58, %v1675_v7  ;;  %v1676_v13 = vmul.f32 0.03125, %v1674_v11 }
 0x80a   : > { %v1678_v52 = vsub.f32 %v2979_v51, %v1676_v13  ;;  %v1679_v38 = vmul.f32 %v1677_v12, %v1677_v12 }
 0x80c   : > { %v1681_v61 = vsel %vm420_vm0, %v1679_v38, 0.0  ;;  %v1680_v57 = vmul.f32 %v1678_v52, %v1678_v52 }
 0x80d   : > { %1682 = vadd.xlane.f32.xlu0 %v1681_v61 }
 0x80e   : > { %v1684_v1 = vsel %vm420_vm0, %v1680_v57, 0.0 }
 0x811   : > { %1685 = vadd.xlane.f32.xlu0 %v1684_v1 }
 0x89a   : > { %v1683_v40 = vpop.xlane.xlu0 %1682 }
 0x89b   : > { %v1687_v9 = vmul.f32 0.03125, %v1683_v40 }
 0x89d   : > { %v1689_v20 = vadd.f32 1e-05, %v1687_v9 }
 0x89e   : > { %v1686_v43 = vpop.xlane.xlu0 %1685 }
 0x89f   : > { %2392 = vrsqrt.f32 %v1689_v20  ;;  %v1688_v6 = vmul.f32 0.03125, %v1686_v43 }
 0x8a1   : > { %v1690_v3 = vadd.f32 1e-05, %v1688_v6 }
 0x8a3   : > { %2394 = vrsqrt.f32 %v1690_v3 }
 0x8a9   : > { %v2393_v39 = vpop.eup %2392 }
 0x8aa   : > { %v1693_v10 = vmul.f32 %v2393_v39, %v1677_v12 }
 0x8ac   : > { %v1701_v32 = vmul.f32 %v2006_v26, %v1693_v10 }
 0x8ad   : > { %v2395_v27 = vpop.eup %2394 }
 0x8ae   : > { %v1694_v33 = vmul.f32 %v2395_v27, %v1678_v52  ;;  %v1709_v35 = vadd.f32 %v2007_v42, %v1701_v32 }
 0x8b0   : > { %v1702_v25 = vmul.f32 %v2006_v26, %v1694_v33 }
 0x8b2   : > { %v1710_v36 = vadd.f32 %v2007_v42, %v1702_v25 }
 0x8b4   : > { %v1711_v37 = vpack.c.bf16 %v1710_v36, %v1709_v35 }
 0x8b6   : > { %2194 = vmatmul.mubr.msk.bf16.vlgmr.msra.gmra.mrb[40].mxu0 %vm420_vm0, %v1711_v37 }
 0x989   : > { %v1772_v30 = vpop.f32.mrb[40].mxu0 }
 0x98a   : > { %v1773_v16 = vadd.f32 %v2008_v48, %v1772_v30  ;;  %v2195_v34 = vpop.f32.mrb[41].mxu0 }
 0x98b   : > { %v1775_v17 = vpop.f32.mrb[42].mxu0 }
 0x98c   : > { %v1776_v29 = vadd.f32 %v2008_v48, %v1775_v17  ;;  %v2196_v49 = vpop.f32.mrb[43].mxu0  ;;  %v1779_v24 = vmax.f32 %v1773_v16, 0.0 }
 0x98e   : > { %v1780_v50 = vmax.f32 %v1776_v29, 0.0 }
 0x990   : > { %v1781_v53 = vpack.c.bf16 %v1780_v50, %v1779_v24 }
 0x992   : > { %2214 = vmatmul.mubr.bf16.vlgmr.msra.gmra.mrb[32].mxu1 %v1781_v53 }
 0xa65   : > { %v1887_v55 = vpop.f32.mrb[32].mxu1 }
 0xa66   : > { %v1888_v44 = vadd.f32 %v2012_v15, %v1887_v55  ;;  %v2215_v45 = vpop.f32.mrb[33].mxu1 }
 0xa67   : > { %v1890_v28 = vpop.f32.mrb[34].mxu1 }
 0xa68   : > { %v1894_v31 = vadd.f32 %v1888_v44, %v2976_v58  ;;  %v1891_v56 = vadd.f32 %v2012_v15, %v1890_v28  ;;  %v2216_v41 = vpop.f32.mrb[35].mxu1 }
 0xa6a   : > { %1896 = vst.msk [vmem:[%s407_s16] sm:$0xff] %vm420_vm0, %v1894_v31  ;;  %v1895_v23 = vadd.f32 %v1891_v56, %v2979_v51 }
 0xa6c   : > { %1897 = vst.msk [vmem:[%s407_s16 + $0x8] sm:$0xff] %vm420_vm0, %v1895_v23 }
 0xa6d   : > { %2411 = shalt.err (!%p2408_p3)
}
 0xa6e   : > { %s2412_s20 = scalar_lea.hbm %s3050_s29, 256  ;;  %s2416_s28 = scalar_lea.hbm %s3107_s12, 512 }
 0xa6f   : > { %p2413_p4 = scmp.ne.s32.totalorder %s3050_s29, %s2412_s20  ;;  %p2417_p9 = scmp.lt.u32.totalorder %s3050_s29, %s3107_s12 }
 0xa70   : > { %p2418_p10 = scmp.lt.u32.totalorder %s2416_s28, %s2412_s20  ;;  %p2420_p12 = scmp.lt.u32.totalorder %s2412_s20, %s3050_s29 }
 0xa71   : > { %p2414_p7 = pnand %p2413_p4, %p2585_p5 }
 0xa72   : > { %p2419_p11 = por %p2418_p10, %p2417_p9 }
 0xa73   : > { %p2415_p8 = pneg %p2414_p7 }
 0xa74   : > { %p2421_p13 = por %p2420_p12, %p2419_p11 }
 0xa76   : > { %p2422_p0 = pnand %p2421_p13, %p2415_p8 }
 0xa78   : > { %2425 = shalt.err (!%p2422_p0)
}
 0xa79   : > { %s2481_s1 = smov 128   ;;  %s3119_s26 = smov 8  }
 0xa7a   : > { %2217 = dma.vmem_to_hbm [thread:$0]  (%p2585_p5), %s3043_s17, 256, %s3050_s29, %s3053_s25, %s2481_s1, %s2481_s1, %s3119_s26  }
 0xa7b PF: > { %p2223_p1 = scmp.ge.s32.totalorder %s2460_s24, 2  ;;  %s1927_s15 = sand.u32 1, %s2448_s21  }
 0xa7c   : > { %s1928_s20 = scalar_lea.sflag [#allocation3], %s1927_s15 }
 0xa7d   : > { %p2220_p2 = pnand %p2223_p1, %p2589_p6 }
 0xa7f   : > { %2443 = dma.done.wait (!%p2220_p2), %s1928_s20, 256  }
 0xa80   : > { %2445 = vsyncadd (!%p2220_p2), %s1928_s20, 4294967040  ;;  %p22_p3 = scmp.ge.s32.totalorder %s2572_s27, 4   ;;  %s3120_s21 = smov %s2452_s22 }
 0xa81   : > { %s3121_s22 = smov %s2456_s23  ;;  %s3122_s23 = smov %s2583_s30 }
 0xa82   : > { %s3123_s24 = smov %s2572_s27  ;;  %24 = sbr.rel (!%p22_p3) target bundleno = 6 (0x6), region = 103 }
 0xa89   :  { %1933 = vsyncpa [#allocation3], 1 }
 0xa8a   :  { %1935 = vsyncpa [#allocation3 + $0x1], 1 }

</bundles_post_ra>
